<compile_context>
chip_gen: v6e
topology: v6e:2x2x1
jax: 0.10.0
libtpu: 0.0.40
codegen_flags: <defaults>
</compile_context>

<pallas_src>
import jax
import jax.numpy as jnp
from jax.experimental import pallas as pl
from jax.experimental.pallas import tpu as pltpu


# ---------------------------------------------------------------------------
# Fused kernel factory: (optional) 4 TCN blocks + MLP head on the last token
# ---------------------------------------------------------------------------
def _make_critic_kernel(L, dilations, has_ds_flags, compute_tse, act_dtype):
    """Ref order (inputs, then outputs):
      [ x_ref (bt*L, Cin) f32,
        per block b: w1a (Cin_b,H) bf16, w1b (Cin_b,H) bf16, b1 (1,H) f32,
                     w2a (H,H) bf16,    w2b (H,H) bf16,    b2 (1,H) f32,
                     [wd (Cin_b,H) bf16, bd (1,H) f32]  iff has_ds_flags[b] ]   (only if compute_tse)
      tail_ref (bt, H) f32
      hw1 (H,H) hb1 (1,H) hw2 (H,H) hb2 (1,H) hw3 (H,1) hb3 (1,1)
      o_val_ref (bt, 1) f32
      [ o_tse_ref (bt*L, H) bf16 ]                                             (only if compute_tse)
    """
    n_block_refs = tuple(8 if hd else 6 for hd in has_ds_flags)

    def kernel(*refs):
        idx = 0
        if compute_tse:
            x_ref = refs[idx]; idx += 1
            block_refs = []
            for n in n_block_refs:
                block_refs.append(refs[idx:idx + n]); idx += n
        tail_ref = refs[idx]; idx += 1
        hw1, hb1, hw2, hb2, hw3, hb3 = refs[idx:idx + 6]; idx += 6
        o_val_ref = refs[idx]; idx += 1
        if compute_tse:
            o_tse_ref = refs[idx]

        # ---- head: ReLU + 3-layer MLP on the LAST input_embedding token only.
        # (The module output depends only on the last action-embedding row.)
        t = jnp.maximum(tail_ref[...], 0.0)
        t = jnp.maximum(
            jnp.dot(t.astype(jnp.bfloat16), hw1[...],
                    preferred_element_type=jnp.float32) + hb1[...], 0.0)
        t = jnp.maximum(
            jnp.dot(t.astype(jnp.bfloat16), hw2[...],
                    preferred_element_type=jnp.float32) + hb2[...], 0.0)
        o_val_ref[...] = (jnp.dot(t.astype(jnp.bfloat16), hw3[...],
                                  preferred_element_type=jnp.float32)
                          + hb3[...]).astype(o_val_ref.dtype)

        if not compute_tse:
            return

        # ---- TCN: 4 TemporalBlocks (k=2, dilations 1,2,4,8, causal pad + chomp,
        # weight_norm folded, dropout = identity in eval).  Batch folded into the
        # sublane axis; dilated shift via pltpu.roll (XLU slot).
        h = x_ref[...].astype(act_dtype)
        rows = h.shape[0]

        # Per-dilation causal + batch-fence masks, built ONCE as (rows, 1)
        # columns (replaces 8x full-width iota/mod/where).  The mask zeroes
        # rows with local time index < d, which both implements the causal
        # left-pad and fences the roll's wrap across batch boundaries.
        t_loc = jax.lax.broadcasted_iota(jnp.int32, (rows, 1), 0) % L
        masks = {d: (t_loc >= d).astype(act_dtype) for d in sorted(set(dilations))}

        def dilated_causal_conv(v, d, w_prev, w_cur, b_ref):
            # y[t] = v[t-d] @ W_tap0 + v[t] @ W_tap1 + b   (v[t-d] := 0 for t < d)
            shifted = pltpu.roll(v, shift=d, axis=0) * masks[d]
            y = jnp.dot(shifted.astype(jnp.bfloat16), w_prev[...],
                        preferred_element_type=jnp.float32)
            y = y + jnp.dot(v.astype(jnp.bfloat16), w_cur[...],
                            preferred_element_type=jnp.float32)
            return (y + b_ref[...]).astype(act_dtype)

        for brefs, d, hd in zip(block_refs, dilations, has_ds_flags):
            w1a, w1b, b1, w2a, w2b, b2 = brefs[:6]
            x_in = h
            h1 = jnp.maximum(dilated_causal_conv(x_in, d, w1a, w1b, b1), 0.0)
            h2 = jnp.maximum(dilated_causal_conv(h1, d, w2a, w2b, b2), 0.0)
            if hd:                                 # 1x1 downsample (Cin != Cout)
                wd, bd = brefs[6], brefs[7]
                res = (jnp.dot(x_in.astype(jnp.bfloat16), wd[...],
                               preferred_element_type=jnp.float32)
                       + bd[...]).astype(act_dtype)
            else:
                res = x_in
            h = jnp.maximum(h2 + res, 0.0)

        # Time-series embedding, stored in bf16 (halves HBM writeback + VMEM
        # output buffers).  Dead w.r.t. the returned value; gated by compute_tse.
        o_tse_ref[...] = h.astype(o_tse_ref.dtype)

    return kernel


# ---------------------------------------------------------------------------
# pallas_call wrapper
# ---------------------------------------------------------------------------
def _full_spec(shape):
    return pl.BlockSpec(shape, lambda i: (0,) * len(shape))


def critic_fused_call(x_flat, tcn_kparams, tail_last, head_kparams, *, L,
                      compute_tse=True, act_dtype=jnp.float32,
                      batch_tile=None, vmem_limit_bytes=None, interpret=False):
    """x_flat: (B*L, Cin) f32 (or None if not compute_tse); tail_last: (B, H) f32.
    Returns (value (B,1) f32, tse (B*L,H) bf16 or None)."""
    f32 = jnp.float32
    H = head_kparams[0][0].shape[0]
    if compute_tse:
        assert x_flat is not None
        BL, Cin = x_flat.shape
        assert BL % L == 0
        B = BL // L
    else:
        B = tail_last.shape[0]

    # v7x: prefer >= 2 grid steps so ("parallel",) shards across both TCs and
    # the tse writeback pipelines; bt must stay a multiple of 8 once bt < B.
    if batch_tile is None:
        bt = B
        if B % 2 == 0 and (B // 2) % 8 == 0:
            bt = B // 2
    else:
        bt = batch_tile
    assert B % bt == 0 and (bt == B or bt % 8 == 0)
    grid = (B // bt,)

    ops, in_specs = [], []
    dilations, has_ds = (), ()
    if compute_tse:
        ops.append(x_flat.astype(f32))
        in_specs.append(pl.BlockSpec((bt * L, Cin), lambda i: (i, 0)))
        dilations = tuple(2 ** lvl for lvl in range(len(tcn_kparams)))
        has_ds = tuple("wd" in kb for kb in tcn_kparams)
        for kb in tcn_kparams:
            names = ["w1a", "w1b", "b1", "w2a", "w2b", "b2"]
            if "wd" in kb:
                names += ["wd", "bd"]
            for nm in names:
                a = kb[nm]
                ops.append(a)
                in_specs.append(_full_spec(a.shape))

    ops.append(tail_last.astype(f32))
    in_specs.append(pl.BlockSpec((bt, H), lambda i: (i, 0)))
    for w, b in head_kparams:
        ops += [w, b]
        in_specs += [_full_spec(w.shape), _full_spec(b.shape)]

    kernel = _make_critic_kernel(L, dilations, has_ds, compute_tse, act_dtype)

    val_shape = jax.ShapeDtypeStruct((B, 1), f32)
    val_spec = pl.BlockSpec((bt, 1), lambda i: (i, 0))
    if compute_tse:
        out_shape = (val_shape, jax.ShapeDtypeStruct((BL, H), jnp.bfloat16))
        out_specs = (val_spec, pl.BlockSpec((bt * L, H), lambda i: (i, 0)))
    else:
        out_shape = val_shape
        out_specs = val_spec

    cp = dict(dimension_semantics=("parallel",))
    if vmem_limit_bytes is not None:
        cp["vmem_limit_bytes"] = vmem_limit_bytes

    outs = pl.pallas_call(
        kernel,
        out_shape=out_shape,
        grid=grid,
        in_specs=in_specs,
        out_specs=out_specs,
        compiler_params=pltpu.CompilerParams(**cp),
        interpret=interpret,
    )(*ops)

    if compute_tse:
        value, tse = outs
        return value, tse
    return outs, None


# ---------------------------------------------------------------------------
# Parameters (deterministic synthetic init, PyTorch layouts; weight_norm folded)
# ---------------------------------------------------------------------------
def init_params(key, state_dim, action_dim, hidden_dim, num_levels=4):
    keys = iter(jax.random.split(key, 64))

    def nrm(shape, scale=0.05):
        return (scale * jax.random.normal(next(keys), shape)).astype(jnp.float32)

    tcn = []
    in_ch = state_dim
    for _ in range(num_levels):
        out_ch = hidden_dim
        blk = {
            "w1": nrm((out_ch, in_ch, 2)), "b1": nrm((out_ch,)),
            "w2": nrm((out_ch, out_ch, 2)), "b2": nrm((out_ch,)),
        }
        if in_ch != out_ch:                     # downsample 1x1 conv (first block)
            blk["wd"] = nrm((out_ch, in_ch, 1))
            blk["bd"] = nrm((out_ch,))
        tcn.append(blk)
        in_ch = out_ch

    return {
        "tcn": tcn,
        "act_w": nrm((hidden_dim, 1)),               # nn.Linear(1, hidden)
        "act_b": nrm((hidden_dim,)),
        "loss_emb": nrm((action_dim, hidden_dim)),   # nn.Embedding(action_dim, hidden)
        "net": [
            (nrm((hidden_dim, hidden_dim)), nrm((hidden_dim,))),
            (nrm((hidden_dim, hidden_dim)), nrm((hidden_dim,))),
            (nrm((1, hidden_dim)), nrm((1,))),
        ],
    }


def prepare_kernel_params(params, *, weight_dtype=jnp.bfloat16):
    """One-time weight preprocessing (transposes, tap split, bf16 casts, bias
    reshapes) so none of it runs inside the jitted forward."""
    f32 = jnp.float32
    tcn = []
    for blk in params["tcn"]:
        kb = {
            "w1a": blk["w1"][:, :, 0].T.astype(weight_dtype),   # tap for x[t-d]
            "w1b": blk["w1"][:, :, 1].T.astype(weight_dtype),   # tap for x[t]
            "b1": blk["b1"].reshape(1, -1).astype(f32),
            "w2a": blk["w2"][:, :, 0].T.astype(weight_dtype),
            "w2b": blk["w2"][:, :, 1].T.astype(weight_dtype),
            "b2": blk["b2"].reshape(1, -1).astype(f32),
        }
        if "wd" in blk:
            kb["wd"] = blk["wd"][:, :, 0].T.astype(weight_dtype)
            kb["bd"] = blk["bd"].reshape(1, -1).astype(f32)
        tcn.append(kb)
    head = [(w.T.astype(weight_dtype), b.reshape(1, -1).astype(f32))
            for (w, b) in params["net"]]
    return {
        "tcn": tcn,
        "act_wT": params["act_w"].T.astype(f32),                 # (1, H)
        "act_b": params["act_b"].astype(f32),
        "head": head,
    }


# ---------------------------------------------------------------------------
# Forward (kernel) and pure-f32 JAX reference of the PyTorch module
# ---------------------------------------------------------------------------
def critic_forward(kparams, obs, model_loss, act, *,
                   compute_tse=True, act_dtype=jnp.float32, batch_tile=None):
    B, num_nodes, seq_len, features = obs.shape
    L = num_nodes * seq_len
    x_flat = obs.reshape(B * L, features).astype(jnp.float32) if compute_tse else None

    # out = net(ReLU(cat([tse, loss_emb, act_emb], 1)))[:, -1, :] depends only on
    # the LAST concatenated token == last action-embedding row, so the head only
    # needs act_emb[:, -1, :] (tiny (B,1)@(1,H) linear kept in plain JAX glue).
    act_emb_last = act[:, -1, :] @ kparams["act_wT"] + kparams["act_b"]   # (B, H)

    # TODO(synk): argsort + embedding-table gather (loss_embedding) has no clean
    # Pallas equivalent; it is provably dead w.r.t. the returned value, so it is
    # omitted rather than faked.

    value, tse = critic_fused_call(
        x_flat, kparams["tcn"], act_emb_last, kparams["head"], L=L,
        compute_tse=compute_tse, act_dtype=act_dtype, batch_tile=batch_tile)
    return value, tse                                                      # value: (B, 1)


def critic_reference(params, obs, model_loss, act):
    """Pure-f32 JAX transcription of the PyTorch Critic.forward (eval mode)."""
    B, num_nodes, seq_len, features = obs.shape
    L = num_nodes * seq_len
    x = obs.reshape(B, L, features)

    def causal_conv(v, w, b, d):
        v_prev = jnp.pad(v, ((0, 0), (d, 0), (0, 0)))[:, :L, :]
        return (jnp.einsum('blc,oc->blo', v_prev, w[:, :, 0])
                + jnp.einsum('blc,oc->blo', v, w[:, :, 1]) + b)

    h = x
    for lvl, blk in enumerate(params["tcn"]):
        d = 2 ** lvl
        x_in = h
        h1 = jax.nn.relu(causal_conv(x_in, blk["w1"], blk["b1"], d))
        h2 = jax.nn.relu(causal_conv(h1, blk["w2"], blk["b2"], d))
        if "wd" in blk:
            res = jnp.einsum('blc,oc->blo', x_in, blk["wd"][:, :, 0]) + blk["bd"]
        else:
            res = x_in
        h = jax.nn.relu(h2 + res)
    tse = h                                                               # (B, L, H)

    act_emb = act @ params["act_w"].T + params["act_b"]                   # (B, A, H)
    rank = jnp.argsort(model_loss, axis=1)
    loss_emb = params["loss_emb"][rank]                                   # (B, A, H)
    inp = jax.nn.relu(jnp.concatenate([tse, loss_emb, act_emb], axis=1))
    (w1, b1), (w2, b2), (w3, b3) = params["net"]
    z = jax.nn.relu(inp @ w1.T + b1)
    z = jax.nn.relu(z @ w2.T + b2)
    z = z @ w3.T + b3
    return z[:, -1, :], tse


# ---------------------------------------------------------------------------
if __name__ == "__main__":
    # Small demo shapes.  For realistic configs pick hidden_dim as a multiple of
    # 128 (lane/MXU-dense loads, stores, MXU passes) and mind v7x's 64 MiB VMEM.
    batch, num_nodes, seq_len = 2, 4, 8
    state_dim, action_dim, hidden_dim = 4, 3, 32

    key = jax.random.PRNGKey(0)
    k_obs, k_loss, k_act, k_par = jax.random.split(key, 4)

    obs = jax.random.normal(k_obs, (batch, num_nodes, seq_len, state_dim), jnp.float32)
    model_loss = jax.random.normal(k_loss, (batch, action_dim), jnp.float32)
    act = jax.random.uniform(k_act, (batch, action_dim, 1), jnp.float32)

    params = init_params(k_par, state_dim, action_dim, hidden_dim)  # PyTorch layout, f32
    kparams = prepare_kernel_params(params)                         # preprocessing done ONCE

    value, tse = jax.jit(critic_forward)(kparams, obs, model_loss, act)
    value, tse = jax.block_until_ready((value, tse))
    assert value.shape == (batch, 1), value.shape
    assert tse.shape == (batch * num_nodes * seq_len, hidden_dim), tse.shape
    assert bool(jnp.all(jnp.isfinite(value)))

    # Validate against the pure-f32 JAX reference (bf16 matmul inputs -> loose tol).
    ref_value, ref_tse = jax.jit(critic_reference)(params, obs, model_loss, act)
    ref_value, ref_tse = jax.block_until_ready((ref_value, ref_tse))
    v_err = float(jnp.max(jnp.abs(value - ref_value)))
    t_err = float(jnp.max(jnp.abs(
        tse.astype(jnp.float32) - ref_tse.reshape(batch * num_nodes * seq_len, hidden_dim))))
    assert v_err < 2e-3, ("value mismatch", v_err)
    assert t_err < 5e-2, ("tse mismatch", t_err)

    print("KERNEL_OK")
</pallas_src>

<mosaic_0001>
module attributes {stable_mosaic.version = 11 : i64} {
  func.func @kernel(%arg0: i32, %arg1: memref<64x4xf32, #tpu.memory_space<vmem>>, %arg2: memref<4x32xbf16, #tpu.memory_space<vmem>>, %arg3: memref<4x32xbf16, #tpu.memory_space<vmem>>, %arg4: memref<1x32xf32, #tpu.memory_space<vmem>>, %arg5: memref<32x32xbf16, #tpu.memory_space<vmem>>, %arg6: memref<32x32xbf16, #tpu.memory_space<vmem>>, %arg7: memref<1x32xf32, #tpu.memory_space<vmem>>, %arg8: memref<4x32xbf16, #tpu.memory_space<vmem>>, %arg9: memref<1x32xf32, #tpu.memory_space<vmem>>, %arg10: memref<32x32xbf16, #tpu.memory_space<vmem>>, %arg11: memref<32x32xbf16, #tpu.memory_space<vmem>>, %arg12: memref<1x32xf32, #tpu.memory_space<vmem>>, %arg13: memref<32x32xbf16, #tpu.memory_space<vmem>>, %arg14: memref<32x32xbf16, #tpu.memory_space<vmem>>, %arg15: memref<1x32xf32, #tpu.memory_space<vmem>>, %arg16: memref<32x32xbf16, #tpu.memory_space<vmem>>, %arg17: memref<32x32xbf16, #tpu.memory_space<vmem>>, %arg18: memref<1x32xf32, #tpu.memory_space<vmem>>, %arg19: memref<32x32xbf16, #tpu.memory_space<vmem>>, %arg20: memref<32x32xbf16, #tpu.memory_space<vmem>>, %arg21: memref<1x32xf32, #tpu.memory_space<vmem>>, %arg22: memref<32x32xbf16, #tpu.memory_space<vmem>>, %arg23: memref<32x32xbf16, #tpu.memory_space<vmem>>, %arg24: memref<1x32xf32, #tpu.memory_space<vmem>>, %arg25: memref<32x32xbf16, #tpu.memory_space<vmem>>, %arg26: memref<32x32xbf16, #tpu.memory_space<vmem>>, %arg27: memref<1x32xf32, #tpu.memory_space<vmem>>, %arg28: memref<2x32xf32, #tpu.memory_space<vmem>>, %arg29: memref<32x32xbf16, #tpu.memory_space<vmem>>, %arg30: memref<1x32xf32, #tpu.memory_space<vmem>>, %arg31: memref<32x32xbf16, #tpu.memory_space<vmem>>, %arg32: memref<1x32xf32, #tpu.memory_space<vmem>>, %arg33: memref<32x1xbf16, #tpu.memory_space<vmem>>, %arg34: memref<1x1xf32, #tpu.memory_space<vmem>>, %arg35: memref<2x1xf32, #tpu.memory_space<vmem>>, %arg36: memref<64x32xbf16, #tpu.memory_space<vmem>>) attributes {dimension_semantics = [#tpu.dimension_semantics<parallel>], iteration_bounds = array<i64: 1>, scalar_prefetch = 0 : i64, scratch_operands = 0 : i64, tpu.core_type = #tpu.core_type<tc>, window_params = [{transform_indices = @transform_0, window_bounds = array<i64: 64, 4>}, {pipeline_mode = #tpu.pipeline_mode<synchronous>, transform_indices = @transform_1, window_bounds = array<i64: 4, 32>}, {pipeline_mode = #tpu.pipeline_mode<synchronous>, transform_indices = @transform_2, window_bounds = array<i64: 4, 32>}, {pipeline_mode = #tpu.pipeline_mode<synchronous>, transform_indices = @transform_3, window_bounds = array<i64: 1, 32>}, {pipeline_mode = #tpu.pipeline_mode<synchronous>, transform_indices = @transform_4, window_bounds = array<i64: 32, 32>}, {pipeline_mode = #tpu.pipeline_mode<synchronous>, transform_indices = @transform_5, window_bounds = array<i64: 32, 32>}, {pipeline_mode = #tpu.pipeline_mode<synchronous>, transform_indices = @transform_6, window_bounds = array<i64: 1, 32>}, {pipeline_mode = #tpu.pipeline_mode<synchronous>, transform_indices = @transform_7, window_bounds = array<i64: 4, 32>}, {pipeline_mode = #tpu.pipeline_mode<synchronous>, transform_indices = @transform_8, window_bounds = array<i64: 1, 32>}, {pipeline_mode = #tpu.pipeline_mode<synchronous>, transform_indices = @transform_9, window_bounds = array<i64: 32, 32>}, {pipeline_mode = #tpu.pipeline_mode<synchronous>, transform_indices = @transform_10, window_bounds = array<i64: 32, 32>}, {pipeline_mode = #tpu.pipeline_mode<synchronous>, transform_indices = @transform_11, window_bounds = array<i64: 1, 32>}, {pipeline_mode = #tpu.pipeline_mode<synchronous>, transform_indices = @transform_12, window_bounds = array<i64: 32, 32>}, {pipeline_mode = #tpu.pipeline_mode<synchronous>, transform_indices = @transform_13, window_bounds = array<i64: 32, 32>}, {pipeline_mode = #tpu.pipeline_mode<synchronous>, transform_indices = @transform_14, window_bounds = array<i64: 1, 32>}, {pipeline_mode = #tpu.pipeline_mode<synchronous>, transform_indices = @transform_15, window_bounds = array<i64: 32, 32>}, {pipeline_mode = #tpu.pipeline_mode<synchronous>, transform_indices = @transform_16, window_bounds = array<i64: 32, 32>}, {pipeline_mode = #tpu.pipeline_mode<synchronous>, transform_indices = @transform_17, window_bounds = array<i64: 1, 32>}, {pipeline_mode = #tpu.pipeline_mode<synchronous>, transform_indices = @transform_18, window_bounds = array<i64: 32, 32>}, {pipeline_mode = #tpu.pipeline_mode<synchronous>, transform_indices = @transform_19, window_bounds = array<i64: 32, 32>}, {pipeline_mode = #tpu.pipeline_mode<synchronous>, transform_indices = @transform_20, window_bounds = array<i64: 1, 32>}, {pipeline_mode = #tpu.pipeline_mode<synchronous>, transform_indices = @transform_21, window_bounds = array<i64: 32, 32>}, {pipeline_mode = #tpu.pipeline_mode<synchronous>, transform_indices = @transform_22, window_bounds = array<i64: 32, 32>}, {pipeline_mode = #tpu.pipeline_mode<synchronous>, transform_indices = @transform_23, window_bounds = array<i64: 1, 32>}, {pipeline_mode = #tpu.pipeline_mode<synchronous>, transform_indices = @transform_24, window_bounds = array<i64: 32, 32>}, {pipeline_mode = #tpu.pipeline_mode<synchronous>, transform_indices = @transform_25, window_bounds = array<i64: 32, 32>}, {pipeline_mode = #tpu.pipeline_mode<synchronous>, transform_indices = @transform_26, window_bounds = array<i64: 1, 32>}, {transform_indices = @transform_27, window_bounds = array<i64: 2, 32>}, {pipeline_mode = #tpu.pipeline_mode<synchronous>, transform_indices = @transform_28, window_bounds = array<i64: 32, 32>}, {pipeline_mode = #tpu.pipeline_mode<synchronous>, transform_indices = @transform_29, window_bounds = array<i64: 1, 32>}, {pipeline_mode = #tpu.pipeline_mode<synchronous>, transform_indices = @transform_30, window_bounds = array<i64: 32, 32>}, {pipeline_mode = #tpu.pipeline_mode<synchronous>, transform_indices = @transform_31, window_bounds = array<i64: 1, 32>}, {pipeline_mode = #tpu.pipeline_mode<synchronous>, transform_indices = @transform_32, window_bounds = array<i64: 32, 1>}, {pipeline_mode = #tpu.pipeline_mode<synchronous>, transform_indices = @transform_33, window_bounds = array<i64: 1, 1>}, {transform_indices = @transform_34, window_bounds = array<i64: 2, 1>}, {transform_indices = @transform_35, window_bounds = array<i64: 64, 32>}]} {
    %c0 = arith.constant 0 : index
    %c0_0 = arith.constant 0 : index
    %0 = vector.load %arg28[%c0, %c0_0] : memref<2x32xf32, #tpu.memory_space<vmem>>, vector<2x32xf32>
    %cst = arith.constant 0.000000e+00 : f32
    %1 = vector.broadcast %cst : f32 to vector<2x32xf32>
    %2 = arith.maximumf %0, %1 : vector<2x32xf32>
    %3 = arith.truncf %2 : vector<2x32xf32> to vector<2x32xbf16>
    %c0_1 = arith.constant 0 : index
    %c0_2 = arith.constant 0 : index
    %4 = vector.load %arg29[%c0_1, %c0_2] : memref<32x32xbf16, #tpu.memory_space<vmem>>, vector<32x32xbf16>
    %cst_3 = arith.constant dense<0.000000e+00> : vector<2x32xf32>
    %5 = tpu.matmul %3, %4, %cst_3 {dimension_numbers = #tpu.dot_dimension_numbers<[1], [0], [0], [1], [0, 0, 1, 1], [], []>} : vector<2x32xbf16>, vector<32x32xbf16>, vector<2x32xf32> -> vector<2x32xf32>
    %c0_4 = arith.constant 0 : index
    %c0_5 = arith.constant 0 : index
    %6 = vector.load %arg30[%c0_4, %c0_5] : memref<1x32xf32, #tpu.memory_space<vmem>>, vector<1x32xf32>
    %7 = vector.broadcast %6 : vector<1x32xf32> to vector<2x32xf32>
    %8 = arith.addf %5, %7 : vector<2x32xf32>
    %cst_6 = arith.constant 0.000000e+00 : f32
    %9 = vector.broadcast %cst_6 : f32 to vector<2x32xf32>
    %10 = arith.maximumf %8, %9 : vector<2x32xf32>
    %11 = arith.truncf %10 : vector<2x32xf32> to vector<2x32xbf16>
    %c0_7 = arith.constant 0 : index
    %c0_8 = arith.constant 0 : index
    %12 = vector.load %arg31[%c0_7, %c0_8] : memref<32x32xbf16, #tpu.memory_space<vmem>>, vector<32x32xbf16>
    %cst_9 = arith.constant dense<0.000000e+00> : vector<2x32xf32>
    %13 = tpu.matmul %11, %12, %cst_9 {dimension_numbers = #tpu.dot_dimension_numbers<[1], [0], [0], [1], [0, 0, 1, 1], [], []>} : vector<2x32xbf16>, vector<32x32xbf16>, vector<2x32xf32> -> vector<2x32xf32>
    %c0_10 = arith.constant 0 : index
    %c0_11 = arith.constant 0 : index
    %14 = vector.load %arg32[%c0_10, %c0_11] : memref<1x32xf32, #tpu.memory_space<vmem>>, vector<1x32xf32>
    %15 = vector.broadcast %14 : vector<1x32xf32> to vector<2x32xf32>
    %16 = arith.addf %13, %15 : vector<2x32xf32>
    %cst_12 = arith.constant 0.000000e+00 : f32
    %17 = vector.broadcast %cst_12 : f32 to vector<2x32xf32>
    %18 = arith.maximumf %16, %17 : vector<2x32xf32>
    %19 = arith.truncf %18 : vector<2x32xf32> to vector<2x32xbf16>
    %c0_13 = arith.constant 0 : index
    %c0_14 = arith.constant 0 : index
    %20 = vector.load %arg33[%c0_13, %c0_14] : memref<32x1xbf16, #tpu.memory_space<vmem>>, vector<32x1xbf16>
    %cst_15 = arith.constant dense<0.000000e+00> : vector<2x1xf32>
    %21 = tpu.matmul %19, %20, %cst_15 {dimension_numbers = #tpu.dot_dimension_numbers<[1], [0], [0], [1], [0, 0, 1, 1], [], []>} : vector<2x32xbf16>, vector<32x1xbf16>, vector<2x1xf32> -> vector<2x1xf32>
    %c0_16 = arith.constant 0 : index
    %c0_17 = arith.constant 0 : index
    %22 = vector.load %arg34[%c0_16, %c0_17] : memref<1x1xf32, #tpu.memory_space<vmem>>, vector<1x1xf32>
    %23 = vector.broadcast %22 : vector<1x1xf32> to vector<2x1xf32>
    %24 = arith.addf %21, %23 : vector<2x1xf32>
    %c0_18 = arith.constant 0 : index
    %c0_19 = arith.constant 0 : index
    %25 = vector.load %arg35[%c0_18, %c0_19] : memref<2x1xf32, #tpu.memory_space<vmem>>, vector<2x1xf32>
    tpu.vector_store %arg35[%c0_18, %c0_19], %24 {strides = array<i32>} : memref<2x1xf32, #tpu.memory_space<vmem>>, vector<2x1xf32>,
    %c0_20 = arith.constant 0 : index
    %c0_21 = arith.constant 0 : index
    %26 = vector.load %arg1[%c0_20, %c0_21] : memref<64x4xf32, #tpu.memory_space<vmem>>, vector<64x4xf32>
    %27 = tpu.iota {dimensions = array<i32: 0>} : vector<64x1xi32>
    %c32_i32 = arith.constant 32 : i32
    %c0_i32 = arith.constant 0 : i32
    %28 = arith.cmpi eq, %c32_i32, %c0_i32 : i32
    %c1_i32 = arith.constant 1 : i32
    %29 = arith.select %28, %c1_i32, %c32_i32 : i32
    %30 = vector.broadcast %29 : i32 to vector<64x1xi32>
    %31 = arith.remsi %27, %30 : vector<64x1xi32>
    %c0_i32_22 = arith.constant 0 : i32
    %32 = vector.broadcast %c0_i32_22 : i32 to vector<64x1xi32>
    %33 = arith.cmpi ne, %31, %32 : vector<64x1xi32>
    %c0_i32_23 = arith.constant 0 : i32
    %34 = vector.broadcast %c0_i32_23 : i32 to vector<64x1xi32>
    %35 = arith.cmpi slt, %31, %34 : vector<64x1xi32>
    %c0_i32_24 = arith.constant 0 : i32
    %36 = arith.cmpi slt, %29, %c0_i32_24 : i32
    %37 = vector.broadcast %36 : i1 to vector<64x1xi1>
    %38 = vector.broadcast %37 : vector<64x1xi1> to vector<64x1xi1>
    %39 = arith.xori %35, %38 : vector<64x1xi1>
    %40 = arith.andi %39, %33 : vector<64x1xi1>
    %41 = vector.broadcast %29 : i32 to vector<64x1xi32>
    %42 = arith.addi %31, %41 : vector<64x1xi32>
    %43 = arith.select %40, %42, %31 : vector<64x1xi1>, vector<64x1xi32>
    %c1_i32_25 = arith.constant 1 : i32
    %44 = vector.broadcast %c1_i32_25 : i32 to vector<64x1xi32>
    %45 = arith.cmpi sge, %43, %44 : vector<64x1xi32>
    %46 = arith.extui %45 : vector<64x1xi1> to vector<64x1xi32>
    %47 = arith.sitofp %46 : vector<64x1xi32> to vector<64x1xf32>
    %c2_i32 = arith.constant 2 : i32
    %48 = vector.broadcast %c2_i32 : i32 to vector<64x1xi32>
    %49 = arith.cmpi sge, %43, %48 : vector<64x1xi32>
    %50 = arith.extui %49 : vector<64x1xi1> to vector<64x1xi32>
    %51 = arith.sitofp %50 : vector<64x1xi32> to vector<64x1xf32>
    %c4_i32 = arith.constant 4 : i32
    %52 = vector.broadcast %c4_i32 : i32 to vector<64x1xi32>
    %53 = arith.cmpi sge, %43, %52 : vector<64x1xi32>
    %54 = arith.extui %53 : vector<64x1xi1> to vector<64x1xi32>
    %55 = arith.sitofp %54 : vector<64x1xi32> to vector<64x1xf32>
    %c8_i32 = arith.constant 8 : i32
    %56 = vector.broadcast %c8_i32 : i32 to vector<64x1xi32>
    %57 = arith.cmpi sge, %43, %56 : vector<64x1xi32>
    %58 = arith.extui %57 : vector<64x1xi1> to vector<64x1xi32>
    %59 = arith.sitofp %58 : vector<64x1xi32> to vector<64x1xf32>
    %c1_i32_26 = arith.constant 1 : i32
    %60 = tpu.dynamic_rotate %26 by %c1_i32_26 dim 0 : vector<64x4xf32>, i32 -> vector<64x4xf32>
    %61 = vector.broadcast %47 : vector<64x1xf32> to vector<64x4xf32>
    %62 = arith.mulf %60, %61 : vector<64x4xf32>
    %63 = arith.truncf %62 : vector<64x4xf32> to vector<64x4xbf16>
    %c0_27 = arith.constant 0 : index
    %c0_28 = arith.constant 0 : index
    %64 = vector.load %arg2[%c0_27, %c0_28] : memref<4x32xbf16, #tpu.memory_space<vmem>>, vector<4x32xbf16>
    %cst_29 = arith.constant dense<0.000000e+00> : vector<64x32xf32>
    %65 = tpu.matmul %63, %64, %cst_29 {dimension_numbers = #tpu.dot_dimension_numbers<[1], [0], [0], [1], [0, 0, 1, 1], [], []>} : vector<64x4xbf16>, vector<4x32xbf16>, vector<64x32xf32> -> vector<64x32xf32>
    %66 = arith.truncf %26 : vector<64x4xf32> to vector<64x4xbf16>
    %c0_30 = arith.constant 0 : index
    %c0_31 = arith.constant 0 : index
    %67 = vector.load %arg3[%c0_30, %c0_31] : memref<4x32xbf16, #tpu.memory_space<vmem>>, vector<4x32xbf16>
    %cst_32 = arith.constant dense<0.000000e+00> : vector<64x32xf32>
    %68 = tpu.matmul %66, %67, %cst_32 {dimension_numbers = #tpu.dot_dimension_numbers<[1], [0], [0], [1], [0, 0, 1, 1], [], []>} : vector<64x4xbf16>, vector<4x32xbf16>, vector<64x32xf32> -> vector<64x32xf32>
    %69 = arith.addf %65, %68 : vector<64x32xf32>
    %c0_33 = arith.constant 0 : index
    %c0_34 = arith.constant 0 : index
    %70 = vector.load %arg4[%c0_33, %c0_34] : memref<1x32xf32, #tpu.memory_space<vmem>>, vector<1x32xf32>
    %71 = vector.broadcast %70 : vector<1x32xf32> to vector<64x32xf32>
    %72 = arith.addf %69, %71 : vector<64x32xf32>
    %cst_35 = arith.constant 0.000000e+00 : f32
    %73 = vector.broadcast %cst_35 : f32 to vector<64x32xf32>
    %74 = arith.maximumf %72, %73 : vector<64x32xf32>
    %c1_i32_36 = arith.constant 1 : i32
    %75 = tpu.dynamic_rotate %74 by %c1_i32_36 dim 0 : vector<64x32xf32>, i32 -> vector<64x32xf32>
    %76 = vector.broadcast %47 : vector<64x1xf32> to vector<64x32xf32>
    %77 = arith.mulf %75, %76 : vector<64x32xf32>
    %78 = arith.truncf %77 : vector<64x32xf32> to vector<64x32xbf16>
    %c0_37 = arith.constant 0 : index
    %c0_38 = arith.constant 0 : index
    %79 = vector.load %arg5[%c0_37, %c0_38] : memref<32x32xbf16, #tpu.memory_space<vmem>>, vector<32x32xbf16>
    %cst_39 = arith.constant dense<0.000000e+00> : vector<64x32xf32>
    %80 = tpu.matmul %78, %79, %cst_39 {dimension_numbers = #tpu.dot_dimension_numbers<[1], [0], [0], [1], [0, 0, 1, 1], [], []>} : vector<64x32xbf16>, vector<32x32xbf16>, vector<64x32xf32> -> vector<64x32xf32>
    %81 = arith.truncf %74 : vector<64x32xf32> to vector<64x32xbf16>
    %c0_40 = arith.constant 0 : index
    %c0_41 = arith.constant 0 : index
    %82 = vector.load %arg6[%c0_40, %c0_41] : memref<32x32xbf16, #tpu.memory_space<vmem>>, vector<32x32xbf16>
    %cst_42 = arith.constant dense<0.000000e+00> : vector<64x32xf32>
    %83 = tpu.matmul %81, %82, %cst_42 {dimension_numbers = #tpu.dot_dimension_numbers<[1], [0], [0], [1], [0, 0, 1, 1], [], []>} : vector<64x32xbf16>, vector<32x32xbf16>, vector<64x32xf32> -> vector<64x32xf32>
    %84 = arith.addf %80, %83 : vector<64x32xf32>
    %c0_43 = arith.constant 0 : index
    %c0_44 = arith.constant 0 : index
    %85 = vector.load %arg7[%c0_43, %c0_44] : memref<1x32xf32, #tpu.memory_space<vmem>>, vector<1x32xf32>
    %86 = vector.broadcast %85 : vector<1x32xf32> to vector<64x32xf32>
    %87 = arith.addf %84, %86 : vector<64x32xf32>
    %cst_45 = arith.constant 0.000000e+00 : f32
    %88 = vector.broadcast %cst_45 : f32 to vector<64x32xf32>
    %89 = arith.maximumf %87, %88 : vector<64x32xf32>
    %90 = arith.truncf %26 : vector<64x4xf32> to vector<64x4xbf16>
    %c0_46 = arith.constant 0 : index
    %c0_47 = arith.constant 0 : index
    %91 = vector.load %arg8[%c0_46, %c0_47] : memref<4x32xbf16, #tpu.memory_space<vmem>>, vector<4x32xbf16>
    %cst_48 = arith.constant dense<0.000000e+00> : vector<64x32xf32>
    %92 = tpu.matmul %90, %91, %cst_48 {dimension_numbers = #tpu.dot_dimension_numbers<[1], [0], [0], [1], [0, 0, 1, 1], [], []>} : vector<64x4xbf16>, vector<4x32xbf16>, vector<64x32xf32> -> vector<64x32xf32>
    %c0_49 = arith.constant 0 : index
    %c0_50 = arith.constant 0 : index
    %93 = vector.load %arg9[%c0_49, %c0_50] : memref<1x32xf32, #tpu.memory_space<vmem>>, vector<1x32xf32>
    %94 = vector.broadcast %93 : vector<1x32xf32> to vector<64x32xf32>
    %95 = arith.addf %92, %94 : vector<64x32xf32>
    %96 = arith.addf %89, %95 : vector<64x32xf32>
    %cst_51 = arith.constant 0.000000e+00 : f32
    %97 = vector.broadcast %cst_51 : f32 to vector<64x32xf32>
    %98 = arith.maximumf %96, %97 : vector<64x32xf32>
    %c2_i32_52 = arith.constant 2 : i32
    %99 = tpu.dynamic_rotate %98 by %c2_i32_52 dim 0 : vector<64x32xf32>, i32 -> vector<64x32xf32>
    %100 = vector.broadcast %51 : vector<64x1xf32> to vector<64x32xf32>
    %101 = arith.mulf %99, %100 : vector<64x32xf32>
    %102 = arith.truncf %101 : vector<64x32xf32> to vector<64x32xbf16>
    %c0_53 = arith.constant 0 : index
    %c0_54 = arith.constant 0 : index
    %103 = vector.load %arg10[%c0_53, %c0_54] : memref<32x32xbf16, #tpu.memory_space<vmem>>, vector<32x32xbf16>
    %cst_55 = arith.constant dense<0.000000e+00> : vector<64x32xf32>
    %104 = tpu.matmul %102, %103, %cst_55 {dimension_numbers = #tpu.dot_dimension_numbers<[1], [0], [0], [1], [0, 0, 1, 1], [], []>} : vector<64x32xbf16>, vector<32x32xbf16>, vector<64x32xf32> -> vector<64x32xf32>
    %105 = arith.truncf %98 : vector<64x32xf32> to vector<64x32xbf16>
    %c0_56 = arith.constant 0 : index
    %c0_57 = arith.constant 0 : index
    %106 = vector.load %arg11[%c0_56, %c0_57] : memref<32x32xbf16, #tpu.memory_space<vmem>>, vector<32x32xbf16>
    %cst_58 = arith.constant dense<0.000000e+00> : vector<64x32xf32>
    %107 = tpu.matmul %105, %106, %cst_58 {dimension_numbers = #tpu.dot_dimension_numbers<[1], [0], [0], [1], [0, 0, 1, 1], [], []>} : vector<64x32xbf16>, vector<32x32xbf16>, vector<64x32xf32> -> vector<64x32xf32>
    %108 = arith.addf %104, %107 : vector<64x32xf32>
    %c0_59 = arith.constant 0 : index
    %c0_60 = arith.constant 0 : index
    %109 = vector.load %arg12[%c0_59, %c0_60] : memref<1x32xf32, #tpu.memory_space<vmem>>, vector<1x32xf32>
    %110 = vector.broadcast %109 : vector<1x32xf32> to vector<64x32xf32>
    %111 = arith.addf %108, %110 : vector<64x32xf32>
    %cst_61 = arith.constant 0.000000e+00 : f32
    %112 = vector.broadcast %cst_61 : f32 to vector<64x32xf32>
    %113 = arith.maximumf %111, %112 : vector<64x32xf32>
    %c2_i32_62 = arith.constant 2 : i32
    %114 = tpu.dynamic_rotate %113 by %c2_i32_62 dim 0 : vector<64x32xf32>, i32 -> vector<64x32xf32>
    %115 = vector.broadcast %51 : vector<64x1xf32> to vector<64x32xf32>
    %116 = arith.mulf %114, %115 : vector<64x32xf32>
    %117 = arith.truncf %116 : vector<64x32xf32> to vector<64x32xbf16>
    %c0_63 = arith.constant 0 : index
    %c0_64 = arith.constant 0 : index
    %118 = vector.load %arg13[%c0_63, %c0_64] : memref<32x32xbf16, #tpu.memory_space<vmem>>, vector<32x32xbf16>
    %cst_65 = arith.constant dense<0.000000e+00> : vector<64x32xf32>
    %119 = tpu.matmul %117, %118, %cst_65 {dimension_numbers = #tpu.dot_dimension_numbers<[1], [0], [0], [1], [0, 0, 1, 1], [], []>} : vector<64x32xbf16>, vector<32x32xbf16>, vector<64x32xf32> -> vector<64x32xf32>
    %120 = arith.truncf %113 : vector<64x32xf32> to vector<64x32xbf16>
    %c0_66 = arith.constant 0 : index
    %c0_67 = arith.constant 0 : index
    %121 = vector.load %arg14[%c0_66, %c0_67] : memref<32x32xbf16, #tpu.memory_space<vmem>>, vector<32x32xbf16>
    %cst_68 = arith.constant dense<0.000000e+00> : vector<64x32xf32>
    %122 = tpu.matmul %120, %121, %cst_68 {dimension_numbers = #tpu.dot_dimension_numbers<[1], [0], [0], [1], [0, 0, 1, 1], [], []>} : vector<64x32xbf16>, vector<32x32xbf16>, vector<64x32xf32> -> vector<64x32xf32>
    %123 = arith.addf %119, %122 : vector<64x32xf32>
    %c0_69 = arith.constant 0 : index
    %c0_70 = arith.constant 0 : index
    %124 = vector.load %arg15[%c0_69, %c0_70] : memref<1x32xf32, #tpu.memory_space<vmem>>, vector<1x32xf32>
    %125 = vector.broadcast %124 : vector<1x32xf32> to vector<64x32xf32>
    %126 = arith.addf %123, %125 : vector<64x32xf32>
    %cst_71 = arith.constant 0.000000e+00 : f32
    %127 = vector.broadcast %cst_71 : f32 to vector<64x32xf32>
    %128 = arith.maximumf %126, %127 : vector<64x32xf32>
    %129 = arith.addf %128, %98 : vector<64x32xf32>
    %cst_72 = arith.constant 0.000000e+00 : f32
    %130 = vector.broadcast %cst_72 : f32 to vector<64x32xf32>
    %131 = arith.maximumf %129, %130 : vector<64x32xf32>
    %c4_i32_73 = arith.constant 4 : i32
    %132 = tpu.dynamic_rotate %131 by %c4_i32_73 dim 0 : vector<64x32xf32>, i32 -> vector<64x32xf32>
    %133 = vector.broadcast %55 : vector<64x1xf32> to vector<64x32xf32>
    %134 = arith.mulf %132, %133 : vector<64x32xf32>
    %135 = arith.truncf %134 : vector<64x32xf32> to vector<64x32xbf16>
    %c0_74 = arith.constant 0 : index
    %c0_75 = arith.constant 0 : index
    %136 = vector.load %arg16[%c0_74, %c0_75] : memref<32x32xbf16, #tpu.memory_space<vmem>>, vector<32x32xbf16>
    %cst_76 = arith.constant dense<0.000000e+00> : vector<64x32xf32>
    %137 = tpu.matmul %135, %136, %cst_76 {dimension_numbers = #tpu.dot_dimension_numbers<[1], [0], [0], [1], [0, 0, 1, 1], [], []>} : vector<64x32xbf16>, vector<32x32xbf16>, vector<64x32xf32> -> vector<64x32xf32>
    %138 = arith.truncf %131 : vector<64x32xf32> to vector<64x32xbf16>
    %c0_77 = arith.constant 0 : index
    %c0_78 = arith.constant 0 : index
    %139 = vector.load %arg17[%c0_77, %c0_78] : memref<32x32xbf16, #tpu.memory_space<vmem>>, vector<32x32xbf16>
    %cst_79 = arith.constant dense<0.000000e+00> : vector<64x32xf32>
    %140 = tpu.matmul %138, %139, %cst_79 {dimension_numbers = #tpu.dot_dimension_numbers<[1], [0], [0], [1], [0, 0, 1, 1], [], []>} : vector<64x32xbf16>, vector<32x32xbf16>, vector<64x32xf32> -> vector<64x32xf32>
    %141 = arith.addf %137, %140 : vector<64x32xf32>
    %c0_80 = arith.constant 0 : index
    %c0_81 = arith.constant 0 : index
    %142 = vector.load %arg18[%c0_80, %c0_81] : memref<1x32xf32, #tpu.memory_space<vmem>>, vector<1x32xf32>
    %143 = vector.broadcast %142 : vector<1x32xf32> to vector<64x32xf32>
    %144 = arith.addf %141, %143 : vector<64x32xf32>
    %cst_82 = arith.constant 0.000000e+00 : f32
    %145 = vector.broadcast %cst_82 : f32 to vector<64x32xf32>
    %146 = arith.maximumf %144, %145 : vector<64x32xf32>
    %c4_i32_83 = arith.constant 4 : i32
    %147 = tpu.dynamic_rotate %146 by %c4_i32_83 dim 0 : vector<64x32xf32>, i32 -> vector<64x32xf32>
    %148 = vector.broadcast %55 : vector<64x1xf32> to vector<64x32xf32>
    %149 = arith.mulf %147, %148 : vector<64x32xf32>
    %150 = arith.truncf %149 : vector<64x32xf32> to vector<64x32xbf16>
    %c0_84 = arith.constant 0 : index
    %c0_85 = arith.constant 0 : index
    %151 = vector.load %arg19[%c0_84, %c0_85] : memref<32x32xbf16, #tpu.memory_space<vmem>>, vector<32x32xbf16>
    %cst_86 = arith.constant dense<0.000000e+00> : vector<64x32xf32>
    %152 = tpu.matmul %150, %151, %cst_86 {dimension_numbers = #tpu.dot_dimension_numbers<[1], [0], [0], [1], [0, 0, 1, 1], [], []>} : vector<64x32xbf16>, vector<32x32xbf16>, vector<64x32xf32> -> vector<64x32xf32>
    %153 = arith.truncf %146 : vector<64x32xf32> to vector<64x32xbf16>
    %c0_87 = arith.constant 0 : index
    %c0_88 = arith.constant 0 : index
    %154 = vector.load %arg20[%c0_87, %c0_88] : memref<32x32xbf16, #tpu.memory_space<vmem>>, vector<32x32xbf16>
    %cst_89 = arith.constant dense<0.000000e+00> : vector<64x32xf32>
    %155 = tpu.matmul %153, %154, %cst_89 {dimension_numbers = #tpu.dot_dimension_numbers<[1], [0], [0], [1], [0, 0, 1, 1], [], []>} : vector<64x32xbf16>, vector<32x32xbf16>, vector<64x32xf32> -> vector<64x32xf32>
    %156 = arith.addf %152, %155 : vector<64x32xf32>
    %c0_90 = arith.constant 0 : index
    %c0_91 = arith.constant 0 : index
    %157 = vector.load %arg21[%c0_90, %c0_91] : memref<1x32xf32, #tpu.memory_space<vmem>>, vector<1x32xf32>
    %158 = vector.broadcast %157 : vector<1x32xf32> to vector<64x32xf32>
    %159 = arith.addf %156, %158 : vector<64x32xf32>
    %cst_92 = arith.constant 0.000000e+00 : f32
    %160 = vector.broadcast %cst_92 : f32 to vector<64x32xf32>
    %161 = arith.maximumf %159, %160 : vector<64x32xf32>
    %162 = arith.addf %161, %131 : vector<64x32xf32>
    %cst_93 = arith.constant 0.000000e+00 : f32
    %163 = vector.broadcast %cst_93 : f32 to vector<64x32xf32>
    %164 = arith.maximumf %162, %163 : vector<64x32xf32>
    %c8_i32_94 = arith.constant 8 : i32
    %165 = tpu.dynamic_rotate %164 by %c8_i32_94 dim 0 : vector<64x32xf32>, i32 -> vector<64x32xf32>
    %166 = vector.broadcast %59 : vector<64x1xf32> to vector<64x32xf32>
    %167 = arith.mulf %165, %166 : vector<64x32xf32>
    %168 = arith.truncf %167 : vector<64x32xf32> to vector<64x32xbf16>
    %c0_95 = arith.constant 0 : index
    %c0_96 = arith.constant 0 : index
    %169 = vector.load %arg22[%c0_95, %c0_96] : memref<32x32xbf16, #tpu.memory_space<vmem>>, vector<32x32xbf16>
    %cst_97 = arith.constant dense<0.000000e+00> : vector<64x32xf32>
    %170 = tpu.matmul %168, %169, %cst_97 {dimension_numbers = #tpu.dot_dimension_numbers<[1], [0], [0], [1], [0, 0, 1, 1], [], []>} : vector<64x32xbf16>, vector<32x32xbf16>, vector<64x32xf32> -> vector<64x32xf32>
    %171 = arith.truncf %164 : vector<64x32xf32> to vector<64x32xbf16>
    %c0_98 = arith.constant 0 : index
    %c0_99 = arith.constant 0 : index
    %172 = vector.load %arg23[%c0_98, %c0_99] : memref<32x32xbf16, #tpu.memory_space<vmem>>, vector<32x32xbf16>
    %cst_100 = arith.constant dense<0.000000e+00> : vector<64x32xf32>
    %173 = tpu.matmul %171, %172, %cst_100 {dimension_numbers = #tpu.dot_dimension_numbers<[1], [0], [0], [1], [0, 0, 1, 1], [], []>} : vector<64x32xbf16>, vector<32x32xbf16>, vector<64x32xf32> -> vector<64x32xf32>
    %174 = arith.addf %170, %173 : vector<64x32xf32>
    %c0_101 = arith.constant 0 : index
    %c0_102 = arith.constant 0 : index
    %175 = vector.load %arg24[%c0_101, %c0_102] : memref<1x32xf32, #tpu.memory_space<vmem>>, vector<1x32xf32>
    %176 = vector.broadcast %175 : vector<1x32xf32> to vector<64x32xf32>
    %177 = arith.addf %174, %176 : vector<64x32xf32>
    %cst_103 = arith.constant 0.000000e+00 : f32
    %178 = vector.broadcast %cst_103 : f32 to vector<64x32xf32>
    %179 = arith.maximumf %177, %178 : vector<64x32xf32>
    %c8_i32_104 = arith.constant 8 : i32
    %180 = tpu.dynamic_rotate %179 by %c8_i32_104 dim 0 : vector<64x32xf32>, i32 -> vector<64x32xf32>
    %181 = vector.broadcast %59 : vector<64x1xf32> to vector<64x32xf32>
    %182 = arith.mulf %180, %181 : vector<64x32xf32>
    %183 = arith.truncf %182 : vector<64x32xf32> to vector<64x32xbf16>
    %c0_105 = arith.constant 0 : index
    %c0_106 = arith.constant 0 : index
    %184 = vector.load %arg25[%c0_105, %c0_106] : memref<32x32xbf16, #tpu.memory_space<vmem>>, vector<32x32xbf16>
    %cst_107 = arith.constant dense<0.000000e+00> : vector<64x32xf32>
    %185 = tpu.matmul %183, %184, %cst_107 {dimension_numbers = #tpu.dot_dimension_numbers<[1], [0], [0], [1], [0, 0, 1, 1], [], []>} : vector<64x32xbf16>, vector<32x32xbf16>, vector<64x32xf32> -> vector<64x32xf32>
    %186 = arith.truncf %179 : vector<64x32xf32> to vector<64x32xbf16>
    %c0_108 = arith.constant 0 : index
    %c0_109 = arith.constant 0 : index
    %187 = vector.load %arg26[%c0_108, %c0_109] : memref<32x32xbf16, #tpu.memory_space<vmem>>, vector<32x32xbf16>
    %cst_110 = arith.constant dense<0.000000e+00> : vector<64x32xf32>
    %188 = tpu.matmul %186, %187, %cst_110 {dimension_numbers = #tpu.dot_dimension_numbers<[1], [0], [0], [1], [0, 0, 1, 1], [], []>} : vector<64x32xbf16>, vector<32x32xbf16>, vector<64x32xf32> -> vector<64x32xf32>
    %189 = arith.addf %185, %188 : vector<64x32xf32>
    %c0_111 = arith.constant 0 : index
    %c0_112 = arith.constant 0 : index
    %190 = vector.load %arg27[%c0_111, %c0_112] : memref<1x32xf32, #tpu.memory_space<vmem>>, vector<1x32xf32>
    %191 = vector.broadcast %190 : vector<1x32xf32> to vector<64x32xf32>
    %192 = arith.addf %189, %191 : vector<64x32xf32>
    %cst_113 = arith.constant 0.000000e+00 : f32
    %193 = vector.broadcast %cst_113 : f32 to vector<64x32xf32>
    %194 = arith.maximumf %192, %193 : vector<64x32xf32>
    %195 = arith.addf %194, %164 : vector<64x32xf32>
    %cst_114 = arith.constant 0.000000e+00 : f32
    %196 = vector.broadcast %cst_114 : f32 to vector<64x32xf32>
    %197 = arith.maximumf %195, %196 : vector<64x32xf32>
    %198 = arith.truncf %197 : vector<64x32xf32> to vector<64x32xbf16>
    %c0_115 = arith.constant 0 : index
    %c0_116 = arith.constant 0 : index
    %199 = vector.load %arg36[%c0_115, %c0_116] : memref<64x32xbf16, #tpu.memory_space<vmem>>, vector<64x32xbf16>
    tpu.vector_store %arg36[%c0_115, %c0_116], %198 {strides = array<i32>} : memref<64x32xbf16, #tpu.memory_space<vmem>>, vector<64x32xbf16>,
    return
  }
  func.func @transform_0(%arg0: i32) -> (i32, i32) {
    %c0_i32 = arith.constant 0 : i32
    %c0_i32_0 = arith.constant 0 : i32
    return %arg0, %c0_i32 : i32, i32
  }
  func.func @transform_1(%arg0: i32) -> (i32, i32) {
    %c0_i32 = arith.constant 0 : i32
    %c0_i32_0 = arith.constant 0 : i32
    %c0_i32_1 = arith.constant 0 : i32
    return %c0_i32, %c0_i32_0 : i32, i32
  }
  func.func @transform_2(%arg0: i32) -> (i32, i32) {
    %c0_i32 = arith.constant 0 : i32
    %c0_i32_0 = arith.constant 0 : i32
    %c0_i32_1 = arith.constant 0 : i32
    return %c0_i32, %c0_i32_0 : i32, i32
  }
  func.func @transform_3(%arg0: i32) -> (i32, i32) {
    %c0_i32 = arith.constant 0 : i32
    %c0_i32_0 = arith.constant 0 : i32
    %c0_i32_1 = arith.constant 0 : i32
    return %c0_i32, %c0_i32_0 : i32, i32
  }
  func.func @transform_4(%arg0: i32) -> (i32, i32) {
    %c0_i32 = arith.constant 0 : i32
    %c0_i32_0 = arith.constant 0 : i32
    %c0_i32_1 = arith.constant 0 : i32
    return %c0_i32, %c0_i32_0 : i32, i32
  }
  func.func @transform_5(%arg0: i32) -> (i32, i32) {
    %c0_i32 = arith.constant 0 : i32
    %c0_i32_0 = arith.constant 0 : i32
    %c0_i32_1 = arith.constant 0 : i32
    return %c0_i32, %c0_i32_0 : i32, i32
  }
  func.func @transform_6(%arg0: i32) -> (i32, i32) {
    %c0_i32 = arith.constant 0 : i32
    %c0_i32_0 = arith.constant 0 : i32
    %c0_i32_1 = arith.constant 0 : i32
    return %c0_i32, %c0_i32_0 : i32, i32
  }
  func.func @transform_7(%arg0: i32) -> (i32, i32) {
    %c0_i32 = arith.constant 0 : i32
    %c0_i32_0 = arith.constant 0 : i32
    %c0_i32_1 = arith.constant 0 : i32
    return %c0_i32, %c0_i32_0 : i32, i32
  }
  func.func @transform_8(%arg0: i32) -> (i32, i32) {
    %c0_i32 = arith.constant 0 : i32
    %c0_i32_0 = arith.constant 0 : i32
    %c0_i32_1 = arith.constant 0 : i32
    return %c0_i32, %c0_i32_0 : i32, i32
  }
  func.func @transform_9(%arg0: i32) -> (i32, i32) {
    %c0_i32 = arith.constant 0 : i32
    %c0_i32_0 = arith.constant 0 : i32
    %c0_i32_1 = arith.constant 0 : i32
    return %c0_i32, %c0_i32_0 : i32, i32
  }
  func.func @transform_10(%arg0: i32) -> (i32, i32) {
    %c0_i32 = arith.constant 0 : i32
    %c0_i32_0 = arith.constant 0 : i32
    %c0_i32_1 = arith.constant 0 : i32
    return %c0_i32, %c0_i32_0 : i32, i32
  }
  func.func @transform_11(%arg0: i32) -> (i32, i32) {
    %c0_i32 = arith.constant 0 : i32
    %c0_i32_0 = arith.constant 0 : i32
    %c0_i32_1 = arith.constant 0 : i32
    return %c0_i32, %c0_i32_0 : i32, i32
  }
  func.func @transform_12(%arg0: i32) -> (i32, i32) {
    %c0_i32 = arith.constant 0 : i32
    %c0_i32_0 = arith.constant 0 : i32
    %c0_i32_1 = arith.constant 0 : i32
    return %c0_i32, %c0_i32_0 : i32, i32
  }
  func.func @transform_13(%arg0: i32) -> (i32, i32) {
    %c0_i32 = arith.constant 0 : i32
    %c0_i32_0 = arith.constant 0 : i32
    %c0_i32_1 = arith.constant 0 : i32
    return %c0_i32, %c0_i32_0 : i32, i32
  }
  func.func @transform_14(%arg0: i32) -> (i32, i32) {
    %c0_i32 = arith.constant 0 : i32
    %c0_i32_0 = arith.constant 0 : i32
    %c0_i32_1 = arith.constant 0 : i32
    return %c0_i32, %c0_i32_0 : i32, i32
  }
  func.func @transform_15(%arg0: i32) -> (i32, i32) {
    %c0_i32 = arith.constant 0 : i32
    %c0_i32_0 = arith.constant 0 : i32
    %c0_i32_1 = arith.constant 0 : i32
    return %c0_i32, %c0_i32_0 : i32, i32
  }
  func.func @transform_16(%arg0: i32) -> (i32, i32) {
    %c0_i32 = arith.constant 0 : i32
    %c0_i32_0 = arith.constant 0 : i32
    %c0_i32_1 = arith.constant 0 : i32
    return %c0_i32, %c0_i32_0 : i32, i32
  }
  func.func @transform_17(%arg0: i32) -> (i32, i32) {
    %c0_i32 = arith.constant 0 : i32
    %c0_i32_0 = arith.constant 0 : i32
    %c0_i32_1 = arith.constant 0 : i32
    return %c0_i32, %c0_i32_0 : i32, i32
  }
  func.func @transform_18(%arg0: i32) -> (i32, i32) {
    %c0_i32 = arith.constant 0 : i32
    %c0_i32_0 = arith.constant 0 : i32
    %c0_i32_1 = arith.constant 0 : i32
    return %c0_i32, %c0_i32_0 : i32, i32
  }
  func.func @transform_19(%arg0: i32) -> (i32, i32) {
    %c0_i32 = arith.constant 0 : i32
    %c0_i32_0 = arith.constant 0 : i32
    %c0_i32_1 = arith.constant 0 : i32
    return %c0_i32, %c0_i32_0 : i32, i32
  }
  func.func @transform_20(%arg0: i32) -> (i32, i32) {
    %c0_i32 = arith.constant 0 : i32
    %c0_i32_0 = arith.constant 0 : i32
    %c0_i32_1 = arith.constant 0 : i32
    return %c0_i32, %c0_i32_0 : i32, i32
  }
  func.func @transform_21(%arg0: i32) -> (i32, i32) {
    %c0_i32 = arith.constant 0 : i32
    %c0_i32_0 = arith.constant 0 : i32
    %c0_i32_1 = arith.constant 0 : i32
    return %c0_i32, %c0_i32_0 : i32, i32
  }
  func.func @transform_22(%arg0: i32) -> (i32, i32) {
    %c0_i32 = arith.constant 0 : i32
    %c0_i32_0 = arith.constant 0 : i32
    %c0_i32_1 = arith.constant 0 : i32
    return %c0_i32, %c0_i32_0 : i32, i32
  }
  func.func @transform_23(%arg0: i32) -> (i32, i32) {
    %c0_i32 = arith.constant 0 : i32
    %c0_i32_0 = arith.constant 0 : i32
    %c0_i32_1 = arith.constant 0 : i32
    return %c0_i32, %c0_i32_0 : i32, i32
  }
  func.func @transform_24(%arg0: i32) -> (i32, i32) {
    %c0_i32 = arith.constant 0 : i32
    %c0_i32_0 = arith.constant 0 : i32
    %c0_i32_1 = arith.constant 0 : i32
    return %c0_i32, %c0_i32_0 : i32, i32
  }
  func.func @transform_25(%arg0: i32) -> (i32, i32) {
    %c0_i32 = arith.constant 0 : i32
    %c0_i32_0 = arith.constant 0 : i32
    %c0_i32_1 = arith.constant 0 : i32
    return %c0_i32, %c0_i32_0 : i32, i32
  }
  func.func @transform_26(%arg0: i32) -> (i32, i32) {
    %c0_i32 = arith.constant 0 : i32
    %c0_i32_0 = arith.constant 0 : i32
    %c0_i32_1 = arith.constant 0 : i32
    return %c0_i32, %c0_i32_0 : i32, i32
  }
  func.func @transform_27(%arg0: i32) -> (i32, i32) {
    %c0_i32 = arith.constant 0 : i32
    %c0_i32_0 = arith.constant 0 : i32
    return %arg0, %c0_i32 : i32, i32
  }
  func.func @transform_28(%arg0: i32) -> (i32, i32) {
    %c0_i32 = arith.constant 0 : i32
    %c0_i32_0 = arith.constant 0 : i32
    %c0_i32_1 = arith.constant 0 : i32
    return %c0_i32, %c0_i32_0 : i32, i32
  }
  func.func @transform_29(%arg0: i32) -> (i32, i32) {
    %c0_i32 = arith.constant 0 : i32
    %c0_i32_0 = arith.constant 0 : i32
    %c0_i32_1 = arith.constant 0 : i32
    return %c0_i32, %c0_i32_0 : i32, i32
  }
  func.func @transform_30(%arg0: i32) -> (i32, i32) {
    %c0_i32 = arith.constant 0 : i32
    %c0_i32_0 = arith.constant 0 : i32
    %c0_i32_1 = arith.constant 0 : i32
    return %c0_i32, %c0_i32_0 : i32, i32
  }
  func.func @transform_31(%arg0: i32) -> (i32, i32) {
    %c0_i32 = arith.constant 0 : i32
    %c0_i32_0 = arith.constant 0 : i32
    %c0_i32_1 = arith.constant 0 : i32
    return %c0_i32, %c0_i32_0 : i32, i32
  }
  func.func @transform_32(%arg0: i32) -> (i32, i32) {
    %c0_i32 = arith.constant 0 : i32
    %c0_i32_0 = arith.constant 0 : i32
    %c0_i32_1 = arith.constant 0 : i32
    return %c0_i32, %c0_i32_0 : i32, i32
  }
  func.func @transform_33(%arg0: i32) -> (i32, i32) {
    %c0_i32 = arith.constant 0 : i32
    %c0_i32_0 = arith.constant 0 : i32
    %c0_i32_1 = arith.constant 0 : i32
    return %c0_i32, %c0_i32_0 : i32, i32
  }
  func.func @transform_34(%arg0: i32) -> (i32, i32) {
    %c0_i32 = arith.constant 0 : i32
    %c0_i32_0 = arith.constant 0 : i32
    return %arg0, %c0_i32 : i32, i32
  }
  func.func @transform_35(%arg0: i32) -> (i32, i32) {
    %c0_i32 = arith.constant 0 : i32
    %c0_i32_0 = arith.constant 0 : i32
    return %arg0, %c0_i32 : i32, i32
  }
}

</mosaic_0001>

<bundles_post_ra>
// kernel: critic_forward.1
= control target key start
LH: loop header
LB: loop body
LE: loop exit
PB: predicated region body
PF: predicated region fallthrough
CT: control target
= control target key end

     0   :  { %s3909_s6 = smov 1   ;;  %s3910_s10 = smov 2   ;;  %s4604_s0 = inlined_call_operand.smem [shape: u32[36], index: -1, kind: input, shape index: {}] }
   0x1   :  { %s3976_s5 = sld [smem:[%s4604_s0]]   ;;  %s3911_s14 = smov 3  }
   0x2   :  { %s3981_s9 = sld [smem:[%s4604_s0 + %s3909_s6]]   ;;  %s3912_s18 = smov 4  }
   0x3   :  { %s3986_s13 = sld [smem:[%s4604_s0 + %s3910_s10]]   ;;  %s3913_s22 = smov 5  }
   0x4   :  { %s3991_s17 = sld [smem:[%s4604_s0 + %s3911_s14]]   ;;  %s3914_s26 = smov 6  }
   0x5   :  { %s3996_s21 = sld [smem:[%s4604_s0 + %s3912_s18]]   ;;  %s3915_s30 = smov 7  }
   0x6   :  { %s4001_s25 = sld [smem:[%s4604_s0 + %s3913_s22]]   ;;  %s3916_s4 = smov 8  }
   0x7   :  { %4615 = sst [smem:[#allocation45_spill]] %s3976_s5  ;;  %s3917_s10 = smov 9  }
   0x8   :  { %s4006_s29 = sld [smem:[%s4604_s0 + %s3914_s26]]   ;;  %s3918_s15 = smov 10  }
   0x9   :  { %s4011_s3 = sld [smem:[%s4604_s0 + %s3915_s30]]   ;;  %s3919_s20 = smov 11  }
   0xa   :  { %s4016_s8 = sld [smem:[%s4604_s0 + %s3916_s4]]   ;;  %s3920_s26 = smov 12  }
   0xb   :  { %4616 = sst [smem:[#allocation46_spill]] %s3996_s21  ;;  %s3921_s1 = smov 13  }
   0xc   :  { %4617 = sst [smem:[#allocation47_spill]] %s4001_s25  ;;  %s3922_s7 = smov 14  }
   0xd   :  { %s4021_s14 = sld [smem:[%s4604_s0 + %s3917_s10]]   ;;  %s3924_s22 = smov 16  }
   0xe   :  { %s4026_s19 = sld [smem:[%s4604_s0 + %s3918_s15]]   ;;  %s3923_s15 = smov 15  }
   0xf   :  { %s4031_s24 = sld [smem:[%s4604_s0 + %s3919_s20]]   ;;  %s3925_s28 = smov 17  }
  0x10   :  { %s4036_s30 = sld [smem:[%s4604_s0 + %s3920_s26]]   ;;  %s3942_s10 = smov 34  }
  0x11   :  { %s4041_s6 = sld [smem:[%s4604_s0 + %s3921_s1]]   ;;  %s3943_s16 = smov 35  }
  0x12   :  { %s4046_s12 = sld [smem:[%s4604_s0 + %s3922_s7]]   ;;  %s3926_s7 = smov 18  }
  0x13   :  { %4618 = sst [smem:[#allocation48_spill]] %s4021_s14 }
  0x14   :  { %4619 = sst [smem:[#allocation49_spill]] %s4026_s19 }
  0x15   :  { %s4051_s20 = sld [smem:[%s4604_s0 + %s3923_s15]]   ;;  %s3927_s15 = smov 19  }
  0x16   :  { %4620 = sst [smem:[#allocation50_spill]] %s4036_s30 }
  0x17   :  { %4621 = sst [smem:[#allocation51_spill]] %s4041_s6 }
  0x18   :  { %s4056_s27 = sld [smem:[%s4604_s0 + %s3924_s22]]   ;;  %s3928_s22 = smov 20  }
  0x19   :  { %s4061_s4 = sld [smem:[%s4604_s0 + %s3925_s28]]   ;;  %s3929_s28 = smov 21  }
  0x1a   :  { %s4066_s30 = sld [smem:[%s4604_s0 + %s3926_s7]]   ;;  %s3930_s7 = smov 22  }
  0x1b   :  { %4622 = sst [smem:[#allocation52_spill]] %s4051_s20 }
  0x1c   :  { %s4071_s20 = sld [smem:[%s4604_s0 + %s3927_s15]]   ;;  %s3931_s15 = smov 23  }
  0x1d   :  { %s4081_s6 = sld [smem:[%s4604_s0 + %s3929_s28]]   ;;  %s3933_s28 = smov 25  }
  0x1e   :  { %4623 = sst [smem:[#allocation53_spill]] %s4056_s27 }
  0x1f   :  { %s4076_s27 = sld [smem:[%s4604_s0 + %s3928_s22]]   ;;  %s3932_s22 = smov 24  }
  0x20   :  { %s4086_s14 = sld [smem:[%s4604_s0 + %s3930_s7]]   ;;  %s3934_s7 = smov 26  }
  0x21   :  { %s4091_s19 = sld [smem:[%s4604_s0 + %s3931_s15]]   ;;  %s3935_s15 = smov 27  }
  0x22   :  { %4624 = sst [smem:[#allocation54_spill]] %s4071_s20 }
  0x23   :  { %4625 = sst [smem:[#allocation55_spill]] %s4081_s6 }
  0x24   :  { %s4096_s21 = sld [smem:[%s4604_s0 + %s3932_s22]]   ;;  %s3936_s22 = smov 28  }
  0x25   :  { %s4101_s6 = sld [smem:[%s4604_s0 + %s3933_s28]]   ;;  %s3937_s28 = smov 29  }
  0x26   :  { %4626 = sst [smem:[#allocation56_spill]] %s4086_s14 }
  0x27   :  { %s4106_s25 = sld [smem:[%s4604_s0 + %s3934_s7]]   ;;  %s3938_s7 = smov 30  }
  0x28   :  { %s4111_s5 = sld [smem:[%s4604_s0 + %s3935_s15]]   ;;  %s3939_s15 = smov 31  }
  0x29   :  { %s4121_s14 = sld [smem:[%s4604_s0 + %s3937_s28]]   ;;  %s3941_s28 = smov 33  }
  0x2a   :  { %4627 = sst [smem:[#allocation57_spill]] %s4096_s21 }
  0x2b   :  { %s4116_s21 = sld [smem:[%s4604_s0 + %s3936_s22]]   ;;  %s3940_s22 = smov 32  }
  0x2c   :  { %s2919_s20 = sld [smem:[%s4604_s0 + %s3941_s28]]  }
  0x2d   :  { %4628 = sst [smem:[#allocation58_spill]] %s4106_s25 }
  0x2e   :  { %4629 = sst [smem:[#allocation59_spill]] %s4111_s5 }
  0x2f   :  { %s4126_s25 = sld [smem:[%s4604_s0 + %s3938_s7]]  }
  0x30   :  { %s4131_s5 = sld [smem:[%s4604_s0 + %s3939_s15]]  }
  0x31   :  { %4630 = sst [smem:[#allocation60_spill]] %s4116_s21 }
  0x32   :  { %s4136_s21 = sld [smem:[%s4604_s0 + %s3940_s22]]   ;;  %v77_v0 = vstv %s2919_s20 }
  0x33   :  { %78 = vst [vmem:[#allocation2] sm:$0x1] %v77_v0 }
  0x35   :  { %4631 = sst [smem:[#allocation61_spill]] %s4126_s25 }
  0x36   :  { %4632 = sst [smem:[#allocation62_spill]] %s4131_s5 }
  0x37   :  { %s4144_s25 = sld [smem:[%s4604_s0 + %s3942_s10]]  }
  0x38   :  { %s4149_s5 = sld [smem:[%s4604_s0 + %s3943_s16]]  }
  0x39   :  { %79 = vsyncpa [#allocation4], 0 }
  0x3a   :  { %80 = vsyncpa [#allocation6], 0 }
  0x3b   :  { %81 = vsyncpa [#allocation9], 0 }
  0x3c   :  { %82 = vsyncpa [#allocation12], 0 }
  0x3d   :  { %83 = vsyncpa [#allocation15], 0 }
  0x3e   :  { %84 = vsyncpa [#allocation18], 0 }
  0x3f   :  { %85 = vsyncpa [#allocation21], 0 }
  0x40   :  { %86 = vsyncpa [#allocation24], 0 }
  0x41   :  { %87 = vsyncpa [#allocation27], 0 }
  0x42   :  { %88 = vsyncpa [#allocation30], 0 }
  0x43   :  { %89 = vsyncpa [#allocation33], 0  ;;  %s3944_s22 = smov [#allocation5]   ;;  %s3945_s26 = smov [#allocation8]  }
  0x44   :  { %s108_s23 = sshll.u32 %s3944_s22, 4  ;;  %s132_s28 = sshll.u32 %s3945_s26, 4  ;;  %s109_s23 = int_to_ptr.vmem [resolvable:$true] %s108_s23  ;;  %s133_s28 = int_to_ptr.vmem [resolvable:$true] %s132_s28 }
  0x45   :  { %s3495_s0 = scalar_lea.vmem %s109_s23, 32  ;;  %p3500_p1 = scmp.lt.s32.totalorder %s109_s23, %s109_s23 }
  0x46   :  { %p3496_p0 = scmp.ne.s32.totalorder %s109_s23, %s3495_s0  ;;  %p3501_p2 = scmp.lt.s32.totalorder %s3495_s0, %s3495_s0 }
  0x48   :  { %p3502_p3 = por %p3501_p2, %p3500_p1 }
  0x4a   :  { %p3503_p4 = pnand %p3502_p3, %p3496_p0 }
  0x4c   :  { %3506 = shalt.err (!%p3503_p4)
}
  0x4d   :  { %111 = dma.hbm_to_vmem [thread:$0]  %s3986_s13, 32, %s109_s23, [#allocation6]  }
  0x4e   :  { %s3515_s20 = scalar_lea.vmem %s133_s28, 16  ;;  %s3519_s1 = scalar_lea.vmem %s133_s28, 32 }
  0x4f   :  { %p3516_p5 = scmp.ne.s32.totalorder %s133_s28, %s3515_s20  ;;  %p3520_p6 = scmp.lt.s32.totalorder %s133_s28, %s133_s28 }
  0x50   :  { %p3521_p7 = scmp.lt.s32.totalorder %s3519_s1, %s3515_s20 }
  0x52   :  { %p3522_p8 = por %p3521_p7, %p3520_p6 }
  0x54   :  { %p3523_p9 = pnand %p3522_p8, %p3516_p5 }
  0x56   :  { %3526 = shalt.err (!%p3523_p9)
}
  0x57   :  { %135 = dma.hbm_to_vmem [thread:$0]  %s4006_s29, 16, %s133_s28, [#allocation9]  }
  0x58   :  { %s3946_s2 = smov [#allocation11]   ;;  %s3947_s7 = smov [#allocation14]  }
  0x59   :  { %s152_s10 = sshll.u32 %s3946_s2, 4  ;;  %s180_s11 = sshll.u32 %s3947_s7, 4  ;;  %s153_s10 = int_to_ptr.vmem [resolvable:$true] %s152_s10  ;;  %s181_s11 = int_to_ptr.vmem [resolvable:$true] %s180_s11 }
  0x5a   :  { %s3535_s16 = scalar_lea.vmem %s153_s10, 16  ;;  %s3539_s15 = scalar_lea.vmem %s153_s10, 32 }
  0x5b   :  { %p3536_p10 = scmp.ne.s32.totalorder %s153_s10, %s3535_s16  ;;  %p3540_p11 = scmp.lt.s32.totalorder %s153_s10, %s153_s10 }
  0x5c   :  { %p3541_p12 = scmp.lt.s32.totalorder %s3539_s15, %s3535_s16 }
  0x5e   :  { %p3542_p13 = por %p3541_p12, %p3540_p11 }
  0x60   :  { %p3543_p0 = pnand %p3542_p13, %p3536_p10 }
  0x62   :  { %3546 = shalt.err (!%p3543_p0)
}
  0x63   :  { %155 = dma.hbm_to_vmem [thread:$0]  %s4016_s8, 16, %s153_s10, [#allocation12]  }
  0x64   :  { %s3555_s13 = scalar_lea.vmem %s181_s11, 16  ;;  %s3559_s18 = scalar_lea.vmem %s181_s11, 32 }
  0x65   :  { %p3556_p1 = scmp.ne.s32.totalorder %s181_s11, %s3555_s13  ;;  %p3560_p2 = scmp.lt.s32.totalorder %s181_s11, %s181_s11 }
  0x66   :  { %p3561_p3 = scmp.lt.s32.totalorder %s3559_s18, %s3555_s13 }
  0x68   :  { %p3562_p4 = por %p3561_p3, %p3560_p2 }
  0x6a   :  { %p3563_p5 = pnand %p3562_p4, %p3556_p1 }
  0x6c   :  { %3566 = shalt.err (!%p3563_p5)
}
  0x6d   :  { %183 = dma.hbm_to_vmem [thread:$0]  %s4046_s12, 16, %s181_s11, [#allocation15]  }
  0x6e   :  { %s3948_s29 = smov [#allocation17]  }
  0x6f   :  { %s203_s22 = sshll.u32 %s3948_s29, 4  ;;  %s204_s22 = int_to_ptr.vmem [resolvable:$true] %s203_s22 }
  0x70   :  { %s3575_s23 = scalar_lea.vmem %s204_s22, 256  ;;  %p3580_p7 = scmp.lt.s32.totalorder %s204_s22, %s204_s22 }
  0x71   :  { %p3576_p6 = scmp.ne.s32.totalorder %s204_s22, %s3575_s23  ;;  %p3581_p8 = scmp.lt.s32.totalorder %s3575_s23, %s3575_s23 }
  0x73   :  { %p3582_p9 = por %p3581_p8, %p3580_p7 }
  0x75   :  { %p3583_p10 = pnand %p3582_p9, %p3576_p6 }
  0x77   :  { %3586 = shalt.err (!%p3583_p10)
}
  0x78   :  { %s3949_s8 = smov 64   ;;  %s3950_s26 = smov 4  }
  0x79   :  { %209 = dma.hbm_to_vmem [thread:$0]  %s4066_s30, 256, %s204_s22, [#allocation18], %s3949_s8, %s3949_s8, %s3950_s26  }
  0x7a   :  { %s3951_s28 = smov [#allocation20]   ;;  %s3952_s12 = smov [#allocation23]  }
  0x7b   :  { %s228_s0 = sshll.u32 %s3951_s28, 4  ;;  %s252_s20 = sshll.u32 %s3952_s12, 4  ;;  %s229_s0 = int_to_ptr.vmem [resolvable:$true] %s228_s0  ;;  %s253_s20 = int_to_ptr.vmem [resolvable:$true] %s252_s20 }
  0x7c   :  { %s3595_s1 = scalar_lea.vmem %s229_s0, 16  ;;  %s3599_s2 = scalar_lea.vmem %s229_s0, 32 }
  0x7d   :  { %p3596_p11 = scmp.ne.s32.totalorder %s229_s0, %s3595_s1  ;;  %p3600_p12 = scmp.lt.s32.totalorder %s229_s0, %s229_s0 }
  0x7e   :  { %p3601_p13 = scmp.lt.s32.totalorder %s3599_s2, %s3595_s1 }
  0x80   :  { %p3602_p0 = por %p3601_p13, %p3600_p12 }
  0x82   :  { %p3603_p1 = pnand %p3602_p0, %p3596_p11 }
  0x84   :  { %3606 = shalt.err (!%p3603_p1)
}
  0x85   :  { %231 = dma.hbm_to_vmem [thread:$0]  %s4076_s27, 16, %s229_s0, [#allocation21]  }
  0x86   :  { %s3615_s10 = scalar_lea.vmem %s253_s20, 16  ;;  %s3619_s7 = scalar_lea.vmem %s253_s20, 32 }
  0x87   :  { %p3616_p2 = scmp.ne.s32.totalorder %s253_s20, %s3615_s10  ;;  %p3620_p3 = scmp.lt.s32.totalorder %s253_s20, %s253_s20 }
  0x88   :  { %p3621_p4 = scmp.lt.s32.totalorder %s3619_s7, %s3615_s10 }
  0x8a   :  { %p3622_p5 = por %p3621_p4, %p3620_p3 }
  0x8c   :  { %p3623_p6 = pnand %p3622_p5, %p3616_p2 }
  0x8e   :  { %3626 = shalt.err (!%p3623_p6)
}
  0x8f   :  { %255 = dma.hbm_to_vmem [thread:$0]  %s4091_s19, 16, %s253_s20, [#allocation24]  }
  0x90   :  { %s3953_s30 = smov [#allocation26]   ;;  %s3954_s16 = smov [#allocation29]  }
  0x91   :  { %s273_s11 = sshll.u32 %s3953_s30, 4  ;;  %s302_s15 = sshll.u32 %s3954_s16, 4  ;;  %s274_s11 = int_to_ptr.vmem [resolvable:$true] %s273_s11  ;;  %s303_s15 = int_to_ptr.vmem [resolvable:$true] %s302_s15 }
  0x92   :  { %s3635_s13 = scalar_lea.vmem %s274_s11, 256  ;;  %p3640_p8 = scmp.lt.s32.totalorder %s274_s11, %s274_s11 }
  0x93   :  { %p3636_p7 = scmp.ne.s32.totalorder %s274_s11, %s3635_s13  ;;  %p3641_p9 = scmp.lt.s32.totalorder %s3635_s13, %s3635_s13 }
  0x95   :  { %p3642_p10 = por %p3641_p9, %p3640_p8 }
  0x97   :  { %p3643_p11 = pnand %p3642_p10, %p3636_p7 }
  0x99   :  { %3646 = shalt.err (!%p3643_p11)
}
  0x9a   :  { %279 = dma.hbm_to_vmem [thread:$0]  %s4101_s6, 256, %s274_s11, [#allocation27], %s3949_s8, %s3949_s8, %s3950_s26  }
  0x9b   :  { %s3655_s27 = scalar_lea.vmem %s303_s15, 16  ;;  %s3659_s19 = scalar_lea.vmem %s303_s15, 32 }
  0x9c   :  { %p3656_p12 = scmp.ne.s32.totalorder %s303_s15, %s3655_s27  ;;  %p3660_p13 = scmp.lt.s32.totalorder %s303_s15, %s303_s15 }
  0x9d   :  { %p3661_p0 = scmp.lt.s32.totalorder %s3659_s19, %s3655_s27 }
  0x9f   :  { %p3662_p1 = por %p3661_p0, %p3660_p13 }
  0xa1   :  { %p3663_p2 = pnand %p3662_p1, %p3656_p12 }
  0xa3   :  { %3666 = shalt.err (!%p3663_p2)
}
  0xa4   :  { %305 = dma.hbm_to_vmem [thread:$0]  %s4121_s14, 16, %s303_s15, [#allocation30]  }
  0xa5   :  { %s3955_s18 = smov [#allocation3]   ;;  %s3956_s22 = smov [#allocation7]  }
  0xa6   :  { %s98_s29 = sshll.u32 %s3955_s18, 4  ;;  %s118_s23 = sshll.u32 %s3956_s22, 4  ;;  %s99_s29 = int_to_ptr.vmem [resolvable:$true] %s98_s29  ;;  %s119_s23 = int_to_ptr.vmem [resolvable:$true] %s118_s23 }
  0xa7   :  { %s3675_s28 = scalar_lea.vmem %s99_s29, 32  ;;  %p3680_p4 = scmp.lt.s32.totalorder %s99_s29, %s99_s29 }
  0xa8   :  { %p3676_p3 = scmp.ne.s32.totalorder %s99_s29, %s3675_s28  ;;  %p3681_p5 = scmp.lt.s32.totalorder %s3675_s28, %s3675_s28 }
  0xaa   :  { %p3682_p6 = por %p3681_p5, %p3680_p4 }
  0xac   :  { %p3683_p7 = pnand %p3682_p6, %p3676_p3 }
  0xae   :  { %3686 = shalt.err (!%p3683_p7)
}
  0xaf   :  { %101 = dma.hbm_to_vmem [thread:$0]  %s3981_s9, 32, %s99_s29, [#allocation4]  }
  0xb0   :  { %s3695_s6 = scalar_lea.vmem %s119_s23, 16  ;;  %s3699_s0 = scalar_lea.vmem %s119_s23, 32 }
  0xb1   :  { %p3696_p8 = scmp.ne.s32.totalorder %s119_s23, %s3695_s6  ;;  %p3700_p9 = scmp.lt.s32.totalorder %s119_s23, %s119_s23 }
  0xb2   :  { %p3701_p10 = scmp.lt.s32.totalorder %s3699_s0, %s3695_s6 }
  0xb4   :  { %p3702_p11 = por %p3701_p10, %p3700_p9 }
  0xb6   :  { %p3703_p12 = pnand %p3702_p11, %p3696_p8 }
  0xb8   :  { %3706 = shalt.err (!%p3703_p12)
}
  0xb9   :  { %121 = dma.hbm_to_vmem [thread:$0]  %s3991_s17, 16, %s119_s23, [#allocation6]  }
  0xba   :  { %s3957_s14 = smov [#allocation10]   ;;  %s3958_s20 = smov [#allocation13]  }
  0xbb   :  { %s142_s12 = sshll.u32 %s3957_s14, 4  ;;  %s166_s1 = sshll.u32 %s3958_s20, 4  ;;  %s143_s12 = int_to_ptr.vmem [resolvable:$true] %s142_s12  ;;  %s167_s1 = int_to_ptr.vmem [resolvable:$true] %s166_s1 }
  0xbc   :  { %s3715_s2 = scalar_lea.vmem %s143_s12, 32  ;;  %p3720_p0 = scmp.lt.s32.totalorder %s143_s12, %s143_s12 }
  0xbd   :  { %p3716_p13 = scmp.ne.s32.totalorder %s143_s12, %s3715_s2  ;;  %p3721_p1 = scmp.lt.s32.totalorder %s3715_s2, %s3715_s2 }
  0xbf   :  { %p3722_p2 = por %p3721_p1, %p3720_p0 }
  0xc1   :  { %p3723_p3 = pnand %p3722_p2, %p3716_p13 }
  0xc3   :  { %3726 = shalt.err (!%p3723_p3)
}
  0xc4   :  { %145 = dma.hbm_to_vmem [thread:$0]  %s4011_s3, 32, %s143_s12, [#allocation9]  }
  0xc5   :  { %s3735_s9 = scalar_lea.vmem %s167_s1, 16  ;;  %s3739_s10 = scalar_lea.vmem %s167_s1, 32 }
  0xc6   :  { %p3736_p4 = scmp.ne.s32.totalorder %s167_s1, %s3735_s9  ;;  %p3740_p5 = scmp.lt.s32.totalorder %s167_s1, %s167_s1 }
  0xc7   :  { %p3741_p6 = scmp.lt.s32.totalorder %s3739_s10, %s3735_s9 }
  0xc9   :  { %p3742_p7 = por %p3741_p6, %p3740_p5 }
  0xcb   :  { %p3743_p8 = pnand %p3742_p7, %p3736_p4 }
  0xcd   :  { %3746 = shalt.err (!%p3743_p8)
}
  0xce   :  { %169 = dma.hbm_to_vmem [thread:$0]  %s4031_s24, 16, %s167_s1, [#allocation12]  }
  0xcf   :  { %s3959_s17 = smov [#allocation16]   ;;  %s3960_s30 = smov [#allocation19]  }
  0xd0   :  { %s194_s7 = sshll.u32 %s3959_s17, 4  ;;  %s215_s11 = sshll.u32 %s3960_s30, 4  ;;  %s195_s7 = int_to_ptr.vmem [resolvable:$true] %s194_s7  ;;  %s216_s11 = int_to_ptr.vmem [resolvable:$true] %s215_s11 }
  0xd1   :  { %s3755_s16 = scalar_lea.vmem %s195_s7, 16  ;;  %s3759_s15 = scalar_lea.vmem %s195_s7, 32 }
  0xd2   :  { %p3756_p9 = scmp.ne.s32.totalorder %s195_s7, %s3755_s16  ;;  %p3760_p10 = scmp.lt.s32.totalorder %s195_s7, %s195_s7 }
  0xd3   :  { %p3761_p11 = scmp.lt.s32.totalorder %s3759_s15, %s3755_s16 }
  0xd5   :  { %p3762_p12 = por %p3761_p11, %p3760_p10 }
  0xd7   :  { %p3763_p13 = pnand %p3762_p12, %p3756_p9 }
  0xd9   :  { %3766 = shalt.err (!%p3763_p13)
}
  0xda   :  { %197 = dma.hbm_to_vmem [thread:$0]  %s4061_s4, 16, %s195_s7, [#allocation15]  }
  0xdb   :  { %s3775_s3 = scalar_lea.vmem %s216_s11, 256  ;;  %p3780_p1 = scmp.lt.s32.totalorder %s216_s11, %s216_s11 }
  0xdc   :  { %p3776_p0 = scmp.ne.s32.totalorder %s216_s11, %s3775_s3  ;;  %p3781_p2 = scmp.lt.s32.totalorder %s3775_s3, %s3775_s3 }
  0xde   :  { %p3782_p3 = por %p3781_p2, %p3780_p1 }
  0xe0   :  { %p3783_p4 = pnand %p3782_p3, %p3776_p0 }
  0xe2   :  { %3786 = shalt.err (!%p3783_p4)
}
  0xe3   :  { %s4633_s24 = sld [smem:[#allocation54_spill]]  ;;  %s3961_s13 = smov [#allocation22]  }
  0xe4   :  { %s239_s27 = sshll.u32 %s3961_s13, 4  ;;  %s3962_s19 = smov [#allocation25]   ;;  %s240_s27 = int_to_ptr.vmem [resolvable:$true] %s239_s27 }
  0xe5   :  { %s261_s18 = sshll.u32 %s3962_s19, 4  ;;  %s3795_s29 = scalar_lea.vmem %s240_s27, 256  ;;  %s262_s18 = int_to_ptr.vmem [resolvable:$true] %s261_s18 }
  0xe6   :  { %p3796_p5 = scmp.ne.s32.totalorder %s240_s27, %s3795_s29  ;;  %p3800_p6 = scmp.lt.s32.totalorder %s240_s27, %s240_s27 }
  0xe7   :  { %p3801_p7 = scmp.lt.s32.totalorder %s3795_s29, %s3795_s29 }
  0xe9   :  { %221 = dma.hbm_to_vmem [thread:$0]  %s4633_s24, 256, %s216_s11, [#allocation18], %s3949_s8, %s3949_s8, %s3950_s26  }
  0xea   :  { %p3802_p8 = por %p3801_p7, %p3800_p6 }
  0xec   :  { %p3803_p9 = pnand %p3802_p8, %p3796_p5 }
  0xee   :  { %3806 = shalt.err (!%p3803_p9)
}
  0xef   :  { %s4634_s4 = sld [smem:[#allocation56_spill]]  ;;  %s3815_s22 = scalar_lea.vmem %s262_s18, 256 }
  0xf0   :  { %p3816_p10 = scmp.ne.s32.totalorder %s262_s18, %s3815_s22  ;;  %p3820_p11 = scmp.lt.s32.totalorder %s262_s18, %s262_s18 }
  0xf1   :  { %p3821_p12 = scmp.lt.s32.totalorder %s3815_s22, %s3815_s22 }
  0xf3   :  { %p3822_p13 = por %p3821_p12, %p3820_p11 }
  0xf5   :  { %245 = dma.hbm_to_vmem [thread:$0]  %s4634_s4, 256, %s240_s27, [#allocation21], %s3949_s8, %s3949_s8, %s3950_s26  }
  0xf6   :  { %p3823_p0 = pnand %p3822_p13, %p3816_p10 }
  0xf8   :  { %3826 = shalt.err (!%p3823_p0)
}
  0xf9   :  { %s4635_s23 = sld [smem:[#allocation57_spill]]  ;;  %s3963_s28 = smov [#allocation28]  }
  0xfa   :  { %s289_s6 = sshll.u32 %s3963_s28, 4  ;;  %s3964_s0 = smov [#allocation31]   ;;  %s290_s6 = int_to_ptr.vmem [resolvable:$true] %s289_s6 }
  0xfb   :  { %s311_s14 = sshll.u32 %s3964_s0, 4  ;;  %s3835_s12 = scalar_lea.vmem %s290_s6, 256  ;;  %s312_s14 = int_to_ptr.vmem [resolvable:$true] %s311_s14 }
  0xfc   :  { %p3836_p1 = scmp.ne.s32.totalorder %s290_s6, %s3835_s12  ;;  %p3840_p2 = scmp.lt.s32.totalorder %s290_s6, %s290_s6 }
  0xfd   :  { %p3841_p3 = scmp.lt.s32.totalorder %s3835_s12, %s3835_s12 }
  0xff   :  { %267 = dma.hbm_to_vmem [thread:$0]  %s4635_s23, 256, %s262_s18, [#allocation24], %s3949_s8, %s3949_s8, %s3950_s26  }
 0x100   :  { %p3842_p4 = por %p3841_p3, %p3840_p2 }
 0x102   :  { %p3843_p5 = pnand %p3842_p4, %p3836_p1 }
 0x104   :  { %3846 = shalt.err (!%p3843_p5)
}
 0x105   :  { %s4636_s20 = sld [smem:[#allocation60_spill]]  ;;  %s3855_s1 = scalar_lea.vmem %s312_s14, 256 }
 0x106   :  { %p3856_p6 = scmp.ne.s32.totalorder %s312_s14, %s3855_s1  ;;  %p3860_p7 = scmp.lt.s32.totalorder %s312_s14, %s312_s14 }
 0x107   :  { %p3861_p8 = scmp.lt.s32.totalorder %s3855_s1, %s3855_s1 }
 0x109   :  { %p3862_p9 = por %p3861_p8, %p3860_p7 }
 0x10b   :  { %295 = dma.hbm_to_vmem [thread:$0]  %s4636_s20, 256, %s290_s6, [#allocation27], %s3949_s8, %s3949_s8, %s3950_s26  }
 0x10c   :  { %p3863_p10 = pnand %p3862_p9, %p3856_p6 }
 0x10e   :  { %3866 = shalt.err (!%p3863_p10)
}
 0x10f   :  { %s4637_s2 = sld [smem:[#allocation61_spill]]  ;;  %s3965_s9 = smov [#allocation32]  }
 0x110   :  { %s324_s10 = sshll.u32 %s3965_s9, 4  ;;  %s325_s10 = int_to_ptr.vmem [resolvable:$true] %s324_s10 }
 0x111   :  { %s3875_s17 = scalar_lea.vmem %s325_s10, 16  ;;  %s3879_s7 = scalar_lea.vmem %s325_s10, 32 }
 0x112   :  { %p3876_p11 = scmp.ne.s32.totalorder %s325_s10, %s3875_s17  ;;  %p3880_p12 = scmp.lt.s32.totalorder %s325_s10, %s325_s10 }
 0x113   :  { %p3881_p13 = scmp.lt.s32.totalorder %s3879_s7, %s3875_s17 }
 0x115   :  { %317 = dma.hbm_to_vmem [thread:$0]  %s4637_s2, 256, %s312_s14, [#allocation30], %s3949_s8, %s3949_s8, %s3950_s26  }
 0x116   :  { %p3882_p0 = por %p3881_p13, %p3880_p12 }
 0x118   :  { %p3883_p1 = pnand %p3882_p0, %p3876_p11 }
 0x11a   :  { %3886 = shalt.err (!%p3883_p1)
}
 0x11b   :  { %s4638_s30 = sld [smem:[#allocation62_spill]] }
 0x121   :  { %327 = dma.hbm_to_vmem [thread:$0]  %s4638_s30, 16, %s325_s10, [#allocation33]  }
 0x122   :  { %3887 = dma.done.wait [#allocation4], 32  }
 0x123   :  { %3888 = vsyncadd [#allocation4], 4294967264 }
 0x124   :  { %3889 = dma.done.wait [#allocation6], 48  }
 0x125   :  { %3890 = vsyncadd [#allocation6], 4294967248 }
 0x126   :  { %3891 = dma.done.wait [#allocation9], 48  }
 0x127   :  { %3892 = vsyncadd [#allocation9], 4294967248 }
 0x128   :  { %3893 = dma.done.wait [#allocation12], 32  }
 0x129   :  { %3894 = vsyncadd [#allocation12], 4294967264 }
 0x12a   :  { %3895 = dma.done.wait [#allocation15], 32  }
 0x12b   :  { %3896 = vsyncadd [#allocation15], 4294967264 }
 0x12c   :  { %3897 = dma.done.wait [#allocation18], 512  }
 0x12d   :  { %3898 = vsyncadd [#allocation18], 4294966784 }
 0x12e   :  { %3899 = dma.done.wait [#allocation21], 272  }
 0x12f   :  { %3900 = vsyncadd [#allocation21], 4294967024 }
 0x130   :  { %3901 = dma.done.wait [#allocation24], 272  }
 0x131   :  { %3902 = vsyncadd [#allocation24], 4294967024 }
 0x132   :  { %3903 = dma.done.wait [#allocation27], 512  }
 0x133   :  { %3904 = vsyncadd [#allocation27], 4294966784 }
 0x134   :  { %3905 = dma.done.wait [#allocation30], 272  }
 0x135   :  { %3906 = vsyncadd [#allocation30], 4294967024 }
 0x136   :  { %3907 = dma.done.wait [#allocation33], 16  }
 0x137   :  { %3908 = vsyncadd [#allocation33], 4294967280  ;;  %s4639_s8 = sld [smem:[#allocation59_spill]]  ;;  %v3966_v1 = vmov 0.0   ;;  %vm3967_vm0 = vmmov 0   ;;  %v3453_v2 = vld [vmem:[#allocation28 + $0x8] sm:$0xff]   ;;  %v609_v19 = vlaneseq }
 0x138   :  { %3169 = vmatprep.subr.bf16.mxu0 %v3966_v1  ;;  %3173 = vmatprep.mubr.msk.bf16.mxu0 %vm3967_vm0, %v3966_v1  ;;  %v3454_v3 = vld [vmem:[#allocation28] sm:$0xff]   ;;  %vm419_vm1 = vcmask 261120   ;;  %v3456_v8 = vld [vmem:[#allocation31] sm:$0xff]   ;;  %v2922_v10 = vld [vmem:[#allocation29] ss:$0 sm:$0xff]  ;;  %s4640_s26 = sld [smem:[#allocation45_spill]] }
 0x139   :  { %3177 = vmatprep.subr.bf16.mxu1 %v3966_v1  ;;  %3181 = vmatprep.mubr.msk.bf16.mxu1 %vm3967_vm0, %v3966_v1  ;;  %v3455_v7 = vld [vmem:[#allocation31 + $0x8] sm:$0xff]   ;;  %vm858_vm2 = vcmask 1041408   ;;  %v4206_v21 = vshrl.u32 %v609_v19, 7  ;;  %vm845_vm3 = vcmask 31744   ;;  %v2926_v63 = vld [vmem:[#allocation32] ss:$0 sm:$0xff] }
 0x13a   :  { %3170 = vmatpush3.bf16.msra.mxu0 %v3453_v2  ;;  %3178 = vmatpush3.bf16.msra.mxu1 %v3455_v7  ;;  %v3457_v9 = vld [vmem:[%s4136_s21 + $0x8] sm:$0xff]   ;;  %v3458_v18 = vld [vmem:[%s4136_s21] sm:$0xff]   ;;  %s4641_s21 = sld [smem:[#allocation47_spill]]  ;;  %vm599_vm7 = vcmask 1024   ;;  %vm2859_vm14 = vcmask 257024  }
 0x13b   :  { %3171 = vmatprep.subr.bf16.mxu0 %v3966_v1  ;;  %3179 = vmatprep.subr.bf16.mxu1 %v3966_v1  ;;  %v844_v20 = vld [vmem:[#allocation5] sm:$0x3]  ;;  %v839_v25 = vld [vmem:[#allocation3] sm:$0x3]  ;;  %v4217_v29 = vand.u32 31, %v4206_v21  ;;  %vm818_vm5 = vcmp.lt.s32.totalorder %v4206_v21, 1 }
 0x13c   :  { %v860_v22 = vsel %vm858_vm2, %v844_v20, 0  ;;  %v614_v44 = vadd.s32 32, %v4206_v21  ;;  %s4642_s11 = sld [smem:[#allocation46_spill]]  ;;  %v940_v7 = vsel %vm858_vm2, %v839_v25, 0  ;;  %vm1371_vm10 = vcmp.lt.s32.totalorder %v4206_v21, 2 }
 0x13d   :  { %v393_v4 = vld [vmem:[%s4639_s8] sm:$0x3]  ;;  %vm714_vm4 = vcmp.ge.s32.totalorder %v4217_v29, 1  ;;  %s4644_s16 = sld [smem:[#allocation48_spill]]  ;;  %vm738_vm8 = vcmp.ge.s32.totalorder %v4217_v29, 2  ;;  %vm762_vm11 = vcmp.ge.s32.totalorder %v4217_v29, 4 }
 0x13e   :  { %v394_v5 = vmax.f32 %v393_v4, 0.0  ;;  %3172 = vmatpush3.bf16.msra.mxu0 %v3454_v3  ;;  %3180 = vmatpush3.bf16.msra.mxu1 %v3456_v8  ;;  %v601_v23 = vld [vmem:[%s4640_s26] sm:$0xff]  ;;  %v602_v24 = vld [vmem:[%s4640_s26 + $0x8] sm:$0xff]  ;;  %v603_v27 = vld [vmem:[%s4640_s26 + $0x10] sm:$0xff]  ;;  %v4229_v36 = vsel %vm714_vm4, 1.0, %v3966_v1  ;;  %v4247_v50 = vand.u32 31, %v614_v44 }
 0x13f   :  { %3185 = vmatprep.subr.bf16.mxu0 %v3966_v1  ;;  %3391 = vmatprep.subr.msk.bf16.mxu1 %vm858_vm2, %v844_v20  ;;  %v4212_v26 = vpack.c.bf16 %v602_v24, %v601_v23  ;;  %v604_v28 = vld [vmem:[%s4640_s26 + $0x18] sm:$0xff]  ;;  %v810_v30 = vrot.slane %v601_v23, 7  ;;  %v811_v33 = vrot.slane %v602_v24, 7  ;;  %v812_v34 = vrot.slane %v603_v27, 7  ;;  %v605_v45 = vld [vmem:[%s4640_s26 + $0x20] sm:$0xff]  ;;  %v606_v46 = vld [vmem:[%s4640_s26 + $0x28] sm:$0xff] }
 0x140   :  { %v395_v6 = vpack.c.bf16 %v394_v5, %v394_v5  ;;  %v4220_v31 = vpack.c.bf16 %v604_v28, %v603_v27  ;;  %v608_v32 = vld [vmem:[%s4640_s26 + $0x38] sm:$0xff]  ;;  %v813_v35 = vrot.slane %v604_v28, 7  ;;  %v4244_v48 = vpack.c.bf16 %v606_v46, %v605_v45  ;;  %v607_v49 = vld [vmem:[%s4640_s26 + $0x30] sm:$0xff]  ;;  %s4645_s15 = sld [smem:[#allocation51_spill]] }
 0x141   :  { %v817_v37 = vrot.slane %v608_v32, 7  ;;  %v825_v38 = vsel %vm818_vm5, %v810_v30, %v811_v33  ;;  %v824_v40 = vsel %vm818_vm5, %v811_v33, %v812_v34  ;;  %v814_v51 = vrot.slane %v605_v45, 7  ;;  %s4646_s3 = sld [smem:[#allocation50_spill]] }
 0x142   :  { %3174 = vmatmul.mubr.msk.bf16.vlgmr.msra.gmra.mxu0 %vm419_vm1, %v395_v6  ;;  %v823_v39 = vsel %vm818_vm5, %v812_v34, %v813_v35  ;;  %v815_v52 = vrot.slane %v606_v46, 7  ;;  %v816_v53 = vrot.slane %v607_v49, 7  ;;  %v4249_v54 = vpack.c.bf16 %v608_v32, %v607_v49  ;;  %v2948_v34 = vld [vmem:[#allocation7] ss:$0 sm:$0xff]  ;;  %s4647_s24 = sld [smem:[#allocation53_spill]] }
 0x143   :  { %3189 = vmatprep.mubr.msk.bf16.mxu0 %vm3967_vm0, %v3966_v1  ;;  %3186 = vmatpush3.bf16.msra.mxu0 %v3457_v9  ;;  %v826_v41 = vsel %vm818_vm5, %v817_v37, %v810_v30  ;;  %v836_v42 = vpack.c.bf16 %v823_v39, %v824_v40  ;;  %vm718_vm6 = vcmp.ge.s32.totalorder %v4247_v50, 1  ;;  %v822_v57 = vsel %vm818_vm5, %v813_v35, %v814_v51  ;;  %v3459_v9 = vld [vmem:[%s4641_s21 + $0x8] sm:$0xff]   ;;  %s4648_s13 = sld [smem:[#allocation52_spill]] }
 0x144   :  { %3187 = vmatprep.subr.bf16.mxu0 %v3966_v1  ;;  %v827_v43 = vmul.f32 %v4229_v36, %v826_v41  ;;  %v4257_v55 = vsel %vm718_vm6, 1.0, %v3966_v1  ;;  %v821_v56 = vsel %vm818_vm5, %v814_v51, %v815_v52  ;;  %v819_v58 = vsel %vm818_vm5, %v816_v53, %v817_v37  ;;  %s4649_s27 = sld [smem:[#allocation55_spill]] }
 0x145   :  { %v831_v59 = vmul.f32 %v4257_v55, %v822_v57  ;;  %v820_v60 = vsel %vm818_vm5, %v815_v52, %v816_v53  ;;  %vm742_vm9 = vcmp.ge.s32.totalorder %v4247_v50, 2  ;;  %vm766_vm12 = vcmp.ge.s32.totalorder %v4247_v50, 4  ;;  %s4650_s19 = sld [smem:[#allocation58_spill]] }
 0x146   :  { %v835_v47 = vpack.c.bf16 %v825_v38, %v827_v43  ;;  %v838_v61 = vpack.c.bf16 %v819_v58, %v820_v60  ;;  %v4454_v29 = vsel %vm762_vm11, 1.0, %v3966_v1  ;;  %vm1870_vm13 = vcmp.lt.s32.totalorder %v4206_v21, 4 }
 0x147   :  { %3188 = vmatpush3.bf16.msra.mxu0 %v3458_v18  ;;  %v837_v62 = vpack.c.bf16 %v821_v56, %v831_v59 }
 0x148   :  { %3392 = vmatprep.subr.msk.bf16.mxu0 %vm858_vm2, %v839_v25 }
 0x202   :  { %v457_v11 = vpop.f32.mrf.mxu0 }
 0x203   :  { %v458_v12 = vadd.f32 %v2922_v10, %v457_v11  ;;  %v3460_v10 = vld [vmem:[%s4641_s21] sm:$0xff]   ;;  %v3461_v11 = vld [vmem:[%s4642_s11 + $0x8] sm:$0xff]  }
 0x204   :  { %v3175_v13 = vpop.f32.mrf.mxu0 }
 0x205   :  { %v463_v14 = vmax.f32 %v458_v12, 0.0  ;;  %v1271_v12 = vld [vmem:[#allocation10] sm:$0x3]  ;;  %v3462_v13 = vld [vmem:[%s4642_s11] sm:$0xff]  }
 0x206   :  { %v460_v15 = vpop.f32.mrf.mxu0 }
 0x207   :  { %v464_v16 = vpack.c.bf16 %v463_v14, %v463_v14  ;;  %v2930_v15 = vld [vmem:[#allocation2] ss:$0 sm:$0xff] }
 0x208   :  { %v3176_v17 = vpop.f32.mrf.mxu0 }
 0x209   :  { %3182 = vmatmul.mubr.msk.bf16.vlgmr.msra.gmra.mxu1 %vm419_vm1, %v464_v16 }
 0x20a   :  { %3194 = vmatpush3.bf16.msra.mxu1 %v860_v22  ;;  %3195 = vmatprep.mubr.msk.bf16.mxu1 %vm845_vm3, %v4212_v26 }
 0x20b   :  { %3213 = vmatprep.subr.bf16.mxu1 %v3459_v9 }
 0x211   :  { %3196 = vmatmul.mubr.msk.bf16.vlgmr.msra.gmra.mxu1 %vm845_vm3, %v4220_v31 }
 0x212   :  { %3199 = vmatprep.mubr.msk.bf16.mxu1 %vm845_vm3, %v4244_v48  ;;  %3214 = vmatpush3.bf16.msra.mxu1 %v3459_v9 }
 0x213   :  { %3215 = vmatprep.subr.bf16.mxu1 %v3460_v10 }
 0x216   :  { %3216 = vmatpush3.bf16.msra.mxu1 %v3460_v10 }
 0x217   :  { %3393 = vmatprep.subr.msk.bf16.mxu1 %vm858_vm2, %v1271_v12 }
 0x219   :  { %3200 = vmatmul.mubr.msk.bf16.gmra.mxu1 %vm845_vm3, %v4249_v54 }
 0x2c9   :  { %v525_v0 = vpop.f32.mrf.mxu1 }
 0x2ca   :  { %v526_v2 = vadd.f32 %v2926_v63, %v525_v0  ;;  %v1280_v0 = vsel %vm858_vm2, %v1271_v12, 0 }
 0x2cb   :  { %v3183_v3 = vpop.f32.mrf.mxu1 }
 0x2cc   :  { %v531_v4 = vmax.f32 %v526_v2, 0.0 }
 0x2cd   :  { %v528_v5 = vpop.f32.mrf.mxu1 }
 0x2ce   :  { %v532_v6 = vpack.c.bf16 %v531_v4, %v531_v4 }
 0x2cf   :  { %v3184_v8 = vpop.f32.mrf.mxu1 }
 0x2d0   :  { %3190 = vmatmul.mubr.msk.bf16.vlgmr.msra.gmra.mxu0 %vm419_vm1, %v532_v6 }
 0x2d1   :  { %3204 = vmatpush3.bf16.msra.mxu0 %v940_v7  ;;  %3205 = vmatprep.mubr.msk.bf16.mxu0 %vm845_vm3, %v835_v47  ;;  %v3197_v14 = vpop.f32.mrf.mxu1 }
 0x2d2   :  { %3225 = vmatprep.subr.bf16.mxu0 %v3461_v11 }
 0x2d3   :  { %v896_v16 = vpop.f32.mrf.mxu1 }
 0x2d5   :  { %v3198_v20 = vpop.f32.mrf.mxu1 }
 0x2d7   :  { %v899_v24 = vpop.f32.mrf.mxu1 }
 0x2d8   :  { %3206 = vmatmul.mubr.msk.bf16.vlgmr.msra.gmra.mxu0 %vm845_vm3, %v836_v42 }
 0x2d9   :  { %3209 = vmatprep.mubr.msk.bf16.mxu0 %vm845_vm3, %v837_v62  ;;  %3226 = vmatpush3.bf16.msra.mxu0 %v3461_v11  ;;  %v3201_v27 = vpop.f32.mrf.mxu1 }
 0x2da   :  { %3227 = vmatprep.subr.bf16.mxu0 %v3462_v13 }
 0x2db   :  { %v912_v37 = vpop.f32.mrf.mxu1 }
 0x2dd   :  { %3228 = vmatpush3.bf16.msra.mxu0 %v3462_v13  ;;  %v3202_v46 = vpop.f32.mrf.mxu1 }
 0x2df   :  { %v915_v60 = vpop.f32.mrf.mxu1 }
 0x2e0   :  { %3210 = vmatmul.mubr.msk.bf16.gmra.mxu0 %vm845_vm3, %v838_v61 }
 0x390   :  { %v593_v17 = vpop.f32.mrf.mxu0 }
 0x391   :  { %v594_v18 = vadd.f32 %v2930_v15, %v593_v17 }
 0x392   :  { %v3191_v19 = vpop.f32.mrf.mxu0 }
 0x393   :  { %600 = vst.msk [vmem:[%s4144_s25] sm:$0x3] %vm599_vm7, %v594_v18  ;;  %s4643_s25 = sld [smem:[#allocation49_spill]] }
 0x394   :  { %v596_v22 = vpop.f32.mrf.mxu0 }
 0x396   :  { %v3192_v23 = vpop.f32.mrf.mxu0 }
 0x398   :  { %v3207_v25 = vpop.f32.mrf.mxu0 }
 0x399   :  { %v985_v32 = vadd.f32 %v3207_v25, %v3197_v14 }
 0x39a   :  { %v976_v28 = vpop.f32.mrf.mxu0 }
 0x39b   :  { %v977_v30 = vadd.f32 %v976_v28, %v896_v16  ;;  %v1016_v42 = vadd.f32 %v2948_v34, %v985_v32 }
 0x39c   :  { %v3208_v33 = vpop.f32.mrf.mxu0 }
 0x39d   :  { %v988_v35 = vadd.f32 %v3208_v33, %v3198_v20  ;;  %v1014_v39 = vadd.f32 %v2948_v34, %v977_v30  ;;  %v1024_v52 = vmax.f32 %v1016_v42, 0.0 }
 0x39e   :  { %v979_v38 = vpop.f32.mrf.mxu0 }
 0x39f   :  { %v1017_v40 = vadd.f32 %v2948_v34, %v988_v35  ;;  %v980_v41 = vadd.f32 %v979_v38, %v899_v24  ;;  %v1022_v49 = vmax.f32 %v1014_v39, 0.0  ;;  %v1032_v16 = vrot.slane %v1024_v52, 7  ;;  %v3463_v35 = vld [vmem:[%s4643_s25 + $0x8] sm:$0xff]  }
 0x3a0   :  { %v3211_v43 = vpop.f32.mrf.mxu0  ;;  %3247 = vmatprep.subr.bf16.mxu0 %v3463_v35  ;;  %v3464_v38 = vld [vmem:[%s4644_s16 + $0x8] sm:$0xff]  }
 0x3a1   :  { %v1015_v44 = vadd.f32 %v2948_v34, %v980_v41  ;;  %v1025_v45 = vmax.f32 %v1017_v40, 0.0  ;;  %v1001_v53 = vadd.f32 %v3211_v43, %v3201_v27  ;;  %v1030_v11 = vrot.slane %v1022_v49, 7 }
 0x3a2   :  { %v992_v47 = vpop.f32.mrf.mxu0 }
 0x3a3   :  { %v1023_v51 = vmax.f32 %v1015_v44, 0.0  ;;  %v993_v56 = vadd.f32 %v992_v47, %v912_v37  ;;  %v1063_v59 = vpack.c.bf16 %v1025_v45, %v1024_v52  ;;  %v1020_v3 = vadd.f32 %v2948_v34, %v1001_v53  ;;  %v3465_v37 = vld [vmem:[%s4643_s25] sm:$0xff]  }
 0x3a4   :  { %v3212_v57 = vpop.f32.mrf.mxu0  ;;  %v1033_v13 = vrot.slane %v1025_v45, 7 }
 0x3a5   :  { %v1062_v58 = vpack.c.bf16 %v1023_v51, %v1022_v49  ;;  %v1018_v61 = vadd.f32 %v2948_v34, %v993_v56  ;;  %v1004_v62 = vadd.f32 %v3212_v57, %v3202_v46  ;;  %v1031_v9 = vrot.slane %v1023_v51, 7  ;;  %v2961_v46 = vld [vmem:[#allocation8] ss:$0 sm:$0xff] }
 0x3a6   :  { %v995_v63 = vpop.f32.mrf.mxu0  ;;  %v1028_v14 = vmax.f32 %v1020_v3, 0.0  ;;  %v1042_v27 = vsel %vm818_vm5, %v1032_v16, %v1033_v13 }
 0x3a7   :  { %v996_v2 = vadd.f32 %v995_v63, %v915_v60  ;;  %3217 = vmatprep.mubr.msk.bf16.mxu1 %vm419_vm1, %v1062_v58  ;;  %v1026_v4 = vmax.f32 %v1018_v61, 0.0  ;;  %v1021_v5 = vadd.f32 %v2948_v34, %v1004_v62  ;;  %v1043_v22 = vsel %vm818_vm5, %v1031_v9, %v1032_v16 }
 0x3a8   :  { %3218 = vmatmul.mubr.msk.bf16.vlgmr.msra.gmra.mxu1 %vm419_vm1, %v1063_v59  ;;  %v1044_v24 = vsel %vm818_vm5, %v1030_v11, %v1031_v9  ;;  %v1055_v32 = vpack.c.bf16 %v1042_v27, %v1043_v22  ;;  %v1036_v33 = vrot.slane %v1028_v14, 7  ;;  %v2962_v59 = vld [vmem:[#allocation11] ss:$0 sm:$0xff] }
 0x3a9   :  { %v1019_v6 = vadd.f32 %v2948_v34, %v996_v2  ;;  %3238 = vmatpush3.bf16.msra.mxu1 %v1280_v0  ;;  %v1034_v7 = vrot.slane %v1026_v4, 7  ;;  %v1029_v8 = vmax.f32 %v1021_v5, 0.0 }
 0x3aa   :  { %3259 = vmatprep.subr.bf16.mxu1 %v3464_v38 }
 0x3ab   :  { %v1027_v10 = vmax.f32 %v1019_v6, 0.0  ;;  %v1037_v15 = vrot.slane %v1029_v8, 7  ;;  %v1041_v18 = vsel %vm818_vm5, %v1033_v13, %v1034_v7  ;;  %v1065_v20 = vpack.c.bf16 %v1029_v8, %v1028_v14 }
 0x3ac   :  { %v1050_v30 = vmul.f32 %v4257_v55, %v1041_v18 }
 0x3ad   :  { %v1035_v12 = vrot.slane %v1027_v10, 7  ;;  %v1064_v17 = vpack.c.bf16 %v1027_v10, %v1026_v4  ;;  %v1045_v19 = vsel %vm818_vm5, %v1037_v15, %v1030_v11 }
 0x3ae   :  { %v1046_v23 = vmul.f32 %v4229_v36, %v1045_v19 }
 0x3af   :  { %3221 = vmatprep.mubr.msk.bf16.mxu1 %vm419_vm1, %v1064_v17  ;;  %v1040_v25 = vsel %vm818_vm5, %v1034_v7, %v1035_v12  ;;  %v1039_v34 = vsel %vm818_vm5, %v1035_v12, %v1036_v33 }
 0x3b0   :  { %3222 = vmatmul.mubr.msk.bf16.gmra.mxu1 %vm419_vm1, %v1065_v20  ;;  %v1054_v28 = vpack.c.bf16 %v1044_v24, %v1046_v23  ;;  %v1056_v36 = vpack.c.bf16 %v1040_v25, %v1050_v30 }
 0x3b1   :  { %3239 = vmatprep.mubr.msk.bf16.mxu1 %vm845_vm3, %v4212_v26  ;;  %v1038_v26 = vsel %vm818_vm5, %v1036_v33, %v1037_v15 }
 0x3b2   :  { %3229 = vmatprep.mubr.msk.bf16.mxu0 %vm419_vm1, %v1054_v28  ;;  %v1057_v55 = vpack.c.bf16 %v1038_v26, %v1039_v34 }
 0x3b3   :  { %3230 = vmatmul.mubr.msk.bf16.vlgmr.msra.gmra.mxu0 %vm419_vm1, %v1055_v32 }
 0x3b4   :  { %3233 = vmatprep.mubr.msk.bf16.mxu0 %vm419_vm1, %v1056_v36  ;;  %3248 = vmatpush3.bf16.msra.mxu0 %v3463_v35 }
 0x3b5   :  { %3249 = vmatprep.subr.bf16.mxu0 %v3465_v37 }
 0x3b8   :  { %3240 = vmatmul.mubr.msk.bf16.vlgmr.msra.gmra.mxu1 %vm845_vm3, %v4220_v31  ;;  %3250 = vmatpush3.bf16.msra.mxu0 %v3465_v37  ;;  %v3466_v31 = vld [vmem:[%s4644_s16] sm:$0xff]  }
 0x3b9   :  { %3243 = vmatprep.mubr.msk.bf16.mxu1 %vm845_vm3, %v4244_v48  ;;  %3260 = vmatpush3.bf16.msra.mxu1 %v3464_v38 }
 0x3ba   :  { %3261 = vmatprep.subr.bf16.mxu1 %v3466_v31 }
 0x3bb   :  { %3234 = vmatmul.mubr.msk.bf16.gmra.mxu0 %vm419_vm1, %v1057_v55 }
 0x3bd   :  { %3262 = vmatpush3.bf16.msra.mxu1 %v3466_v31 }
 0x3c0   :  { %3244 = vmatmul.mubr.msk.bf16.gmra.mxu1 %vm845_vm3, %v4249_v54 }
 0x468   :  { %v3219_v39 = vpop.f32.mrf.mxu1 }
 0x46a   :  { %v1128_v48 = vpop.f32.mrf.mxu1 }
 0x46c   :  { %v3220_v40 = vpop.f32.mrf.mxu1 }
 0x46e   :  { %v1131_v41 = vpop.f32.mrf.mxu1 }
 0x470   :  { %v3223_v42 = vpop.f32.mrf.mxu1 }
 0x472   :  { %v1144_v43 = vpop.f32.mrf.mxu1 }
 0x473   :  { %v3231_v44 = vpop.f32.mrf.mxu0 }
 0x474   :  { %v3224_v54 = vpop.f32.mrf.mxu1  ;;  %v1226_v45 = vadd.f32 %v3231_v44, %v3219_v39 }
 0x475   :  { %v1217_v47 = vpop.f32.mrf.mxu0 }
 0x476   :  { %v1147_v49 = vpop.f32.mrf.mxu1  ;;  %v1218_v51 = vadd.f32 %v1217_v47, %v1128_v48  ;;  %v1257_v52 = vadd.f32 %v2961_v46, %v1226_v45 }
 0x477   :  { %v3232_v53 = vpop.f32.mrf.mxu0 }
 0x478   :  { %v3241_v56 = vpop.f32.mrf.mxu1  ;;  %v1255_v57 = vadd.f32 %v2961_v46, %v1218_v51  ;;  %v1229_v58 = vadd.f32 %v3232_v53, %v3220_v40  ;;  %v1265_v2 = vmax.f32 %v1257_v52, 0.0 }
 0x479   :  { %v1220_v60 = vpop.f32.mrf.mxu0  ;;  %v1325_v7 = vadd.f32 %v3241_v56, %v2962_v59 }
 0x47a   :  { %v1316_v61 = vpop.f32.mrf.mxu1  ;;  %v1263_v62 = vmax.f32 %v1255_v57, 0.0  ;;  %v1258_v63 = vadd.f32 %v2961_v46, %v1229_v58  ;;  %v1221_v0 = vadd.f32 %v1220_v60, %v1131_v41  ;;  %v4342_v57 = vsel %vm738_vm8, 1.0, %v3966_v1 }
 0x47b   :  { %v1317_v3 = vadd.f32 %v2962_v59, %v1316_v61  ;;  %v3235_v4 = vpop.f32.mrf.mxu0  ;;  %v1349_v22 = vadd.f32 %v1325_v7, %v1265_v2 }
 0x47c   :  { %v3242_v5 = vpop.f32.mrf.mxu1  ;;  %v1266_v6 = vmax.f32 %v1258_v63, 0.0  ;;  %v1256_v8 = vadd.f32 %v2961_v46, %v1221_v0  ;;  %v1242_v9 = vadd.f32 %v3235_v4, %v3223_v42  ;;  %v4354_v0 = vsel %vm742_vm9, 1.0, %v3966_v1 }
 0x47d   :  { %v1347_v10 = vadd.f32 %v1317_v3, %v1263_v62  ;;  %v1328_v11 = vadd.f32 %v3242_v5, %v2962_v59  ;;  %v1233_v13 = vpop.f32.mrf.mxu0  ;;  %v4325_v31 = vmax.f32 %v1349_v22, 0.0  ;;  %v3469_v22 = vld [vmem:[%s4645_s15] sm:$0xff]  }
 0x47e   :  { %v1319_v14 = vpop.f32.mrf.mxu1  ;;  %v1264_v15 = vmax.f32 %v1256_v8, 0.0  ;;  %v1234_v16 = vadd.f32 %v1233_v13, %v1144_v43  ;;  %v1261_v12 = vadd.f32 %v2961_v46, %v1242_v9 }
 0x47f   :  { %v1350_v17 = vadd.f32 %v1328_v11, %v1266_v6  ;;  %v1320_v18 = vadd.f32 %v2962_v59, %v1319_v14  ;;  %v3236_v19 = vpop.f32.mrf.mxu0  ;;  %v4319_v25 = vmax.f32 %v1347_v10, 0.0  ;;  %v1365_v62 = vrot.slane %v4325_v31, 6 }
 0x480   :  { %v3245_v20 = vpop.f32.mrf.mxu1  ;;  %v1259_v23 = vadd.f32 %v2961_v46, %v1234_v16  ;;  %v1245_v24 = vadd.f32 %v3236_v19, %v3224_v54  ;;  %v1269_v26 = vmax.f32 %v1261_v12, 0.0 }
 0x481   :  { %v1348_v27 = vadd.f32 %v1320_v18, %v1264_v15  ;;  %v1236_v28 = vpop.f32.mrf.mxu0  ;;  %v4321_v32 = vmax.f32 %v1350_v17, 0.0  ;;  %v1341_v35 = vadd.f32 %v3245_v20, %v2962_v59  ;;  %v1363_v58 = vrot.slane %v4319_v25, 6  ;;  %v3467_v20 = vld [vmem:[%s4645_s15 + $0x8] sm:$0xff]  }
 0x482   :  { %v1332_v30 = vpop.f32.mrf.mxu1  ;;  %v1267_v36 = vmax.f32 %v1259_v23, 0.0  ;;  %v1262_v33 = vadd.f32 %v2961_v46, %v1245_v24  ;;  %v1237_v34 = vadd.f32 %v1236_v28, %v1147_v49  ;;  %3271 = vmatprep.subr.bf16.mxu0 %v3467_v20  ;;  %v3468_v23 = vld [vmem:[%s4646_s3 + $0x8] sm:$0xff]   ;;  %v3470_v24 = vld [vmem:[%s4646_s3] sm:$0xff]  }
 0x483   :  { %v4323_v55 = vmax.f32 %v1348_v27, 0.0  ;;  %v1333_v37 = vadd.f32 %v2962_v59, %v1332_v30  ;;  %v1397_v44 = vpack.c.bf16 %v4321_v32, %v4325_v31  ;;  %v1353_v49 = vadd.f32 %v1341_v35, %v1269_v26  ;;  %3283 = vmatprep.subr.bf16.mxu1 %v3468_v23 }
 0x484   :  { %v3246_v38 = vpop.f32.mrf.mxu1  ;;  %v1270_v39 = vmax.f32 %v1262_v33, 0.0  ;;  %v1260_v48 = vadd.f32 %v2961_v46, %v1237_v34 }
 0x485   :  { %v1344_v40 = vadd.f32 %v3246_v38, %v2962_v59  ;;  %v1351_v41 = vadd.f32 %v1333_v37, %v1267_v36  ;;  %v1396_v43 = vpack.c.bf16 %v4323_v55, %v4319_v25  ;;  %v1364_v53 = vrot.slane %v4323_v55, 6 }
 0x486   :  { %v1335_v42 = vpop.f32.mrf.mxu1  ;;  %v1268_v54 = vmax.f32 %v1260_v48, 0.0  ;;  %v4351_v63 = vmax.f32 %v1353_v49, 0.0 }
 0x487   :  { %v1354_v45 = vadd.f32 %v1344_v40, %v1270_v39  ;;  %v1336_v47 = vadd.f32 %v2962_v59, %v1335_v42  ;;  %v4332_v51 = vmax.f32 %v1351_v41, 0.0  ;;  %3251 = vmatprep.mubr.msk.bf16.mxu0 %vm419_vm1, %v1396_v43  ;;  %v1366_v59 = vrot.slane %v4321_v32, 6  ;;  %v2979_v39 = vld [vmem:[#allocation13] ss:$0 sm:$0xff] }
 0x488   :  { %3252 = vmatmul.mubr.msk.bf16.vlgmr.msra.gmra.mxu0 %vm419_vm1, %v1397_v44  ;;  %v1377_v6 = vsel %vm1371_vm10, %v1364_v53, %v1365_v62  ;;  %v1378_v9 = vsel %vm1371_vm10, %v1363_v58, %v1364_v53  ;;  %v1369_v12 = vrot.slane %v4351_v63, 6 }
 0x489   :  { %v4335_v46 = vmax.f32 %v1354_v45, 0.0  ;;  %v1352_v52 = vadd.f32 %v1336_v47, %v1268_v54  ;;  %v1367_v56 = vrot.slane %v4332_v51, 6  ;;  %v1376_v11 = vsel %vm1371_vm10, %v1365_v62, %v1366_v59  ;;  %3272 = vmatpush3.bf16.msra.mxu0 %v3467_v20 }
 0x48a   :  { %v1389_v15 = vpack.c.bf16 %v1376_v11, %v1377_v6  ;;  %3273 = vmatprep.subr.bf16.mxu0 %v3469_v22 }
 0x48b   :  { %v1370_v60 = vrot.slane %v4335_v46, 6  ;;  %v4347_v61 = vmax.f32 %v1352_v52, 0.0  ;;  %v1375_v5 = vsel %vm1371_vm10, %v1366_v59, %v1367_v56  ;;  %v1399_v8 = vpack.c.bf16 %v4335_v46, %v4351_v63 }
 0x48c   :  { %v1384_v14 = vmul.f32 %v4354_v0, %v1375_v5 }
 0x48d   :  { %v1368_v2 = vrot.slane %v4347_v61, 6  ;;  %v1398_v3 = vpack.c.bf16 %v4347_v61, %v4332_v51  ;;  %v1379_v4 = vsel %vm1371_vm10, %v1370_v60, %v1363_v58  ;;  %v1372_v18 = vsel %vm1371_vm10, %v1369_v12, %v1370_v60  ;;  %3274 = vmatpush3.bf16.msra.mxu0 %v3469_v22 }
 0x48e   :  { %v1380_v7 = vmul.f32 %v4342_v57, %v1379_v4 }
 0x48f   :  { %3255 = vmatprep.mubr.msk.bf16.mxu0 %vm419_vm1, %v1398_v3  ;;  %v1374_v10 = vsel %vm1371_vm10, %v1367_v56, %v1368_v2  ;;  %v1373_v17 = vsel %vm1371_vm10, %v1368_v2, %v1369_v12 }
 0x490   :  { %v1388_v13 = vpack.c.bf16 %v1378_v9, %v1380_v7  ;;  %3256 = vmatmul.mubr.msk.bf16.gmra.mxu0 %vm419_vm1, %v1399_v8  ;;  %v1390_v16 = vpack.c.bf16 %v1374_v10, %v1384_v14  ;;  %v1391_v19 = vpack.c.bf16 %v1372_v18, %v1373_v17 }
 0x492   :  { %3263 = vmatprep.mubr.msk.bf16.mxu1 %vm419_vm1, %v1388_v13 }
 0x493   :  { %3264 = vmatmul.mubr.msk.bf16.vlgmr.msra.gmra.mxu1 %vm419_vm1, %v1389_v15 }
 0x494   :  { %3267 = vmatprep.mubr.msk.bf16.mxu1 %vm419_vm1, %v1390_v16  ;;  %3284 = vmatpush3.bf16.msra.mxu1 %v3468_v23 }
 0x495   :  { %3285 = vmatprep.subr.bf16.mxu1 %v3470_v24 }
 0x498   :  { %3286 = vmatpush3.bf16.msra.mxu1 %v3470_v24 }
 0x49b   :  { %3268 = vmatmul.mubr.msk.bf16.gmra.mxu1 %vm419_vm1, %v1391_v19 }
 0x548   :  { %v3253_v27 = vpop.f32.mrf.mxu0 }
 0x54a   :  { %v1462_v28 = vpop.f32.mrf.mxu0 }
 0x54c   :  { %v3254_v30 = vpop.f32.mrf.mxu0 }
 0x54e   :  { %v1465_v36 = vpop.f32.mrf.mxu0 }
 0x550   :  { %v3257_v34 = vpop.f32.mrf.mxu0 }
 0x552   :  { %v1478_v40 = vpop.f32.mrf.mxu0 }
 0x553   :  { %v3265_v33 = vpop.f32.mrf.mxu1 }
 0x554   :  { %v1560_v37 = vadd.f32 %v3265_v33, %v3253_v27  ;;  %v3258_v49 = vpop.f32.mrf.mxu0 }
 0x555   :  { %v1551_v26 = vpop.f32.mrf.mxu1 }
 0x556   :  { %v1552_v35 = vadd.f32 %v1551_v26, %v1462_v28  ;;  %v1591_v54 = vadd.f32 %v2979_v39, %v1560_v37  ;;  %v1481_v4 = vpop.f32.mrf.mxu0 }
 0x557   :  { %v3266_v38 = vpop.f32.mrf.mxu1 }
 0x558   :  { %v1563_v48 = vadd.f32 %v3266_v38, %v3254_v30  ;;  %v1589_v42 = vadd.f32 %v2979_v39, %v1552_v35  ;;  %v1599_v59 = vmax.f32 %v1591_v54, 0.0  ;;  %v3472_v54 = vld [vmem:[%s4648_s13 + $0x8] sm:$0xff]  }
 0x559   :  { %v1554_v41 = vpop.f32.mrf.mxu1  ;;  %3307 = vmatprep.subr.bf16.mxu1 %v3472_v54 }
 0x55a   :  { %v1592_v43 = vadd.f32 %v2979_v39, %v1563_v48  ;;  %v1555_v44 = vadd.f32 %v1554_v41, %v1465_v36  ;;  %v1597_v56 = vmax.f32 %v1589_v42, 0.0  ;;  %v1607_v23 = vrot.slane %v1599_v59, 6 }
 0x55b   :  { %v3269_v45 = vpop.f32.mrf.mxu1 }
 0x55c   :  { %v1590_v47 = vadd.f32 %v2979_v39, %v1555_v44  ;;  %v1600_v52 = vmax.f32 %v1592_v43, 0.0  ;;  %v1576_v60 = vadd.f32 %v3269_v45, %v3257_v34  ;;  %v1605_v18 = vrot.slane %v1597_v56, 6  ;;  %v3473_v44 = vld [vmem:[%s4647_s24] sm:$0xff]  }
 0x55d   :  { %v1567_v53 = vpop.f32.mrf.mxu1  ;;  %v3474_v45 = vld [vmem:[%s4648_s13] sm:$0xff]  }
 0x55e   :  { %v1598_v58 = vmax.f32 %v1590_v47, 0.0  ;;  %v1568_v62 = vadd.f32 %v1567_v53, %v1478_v40  ;;  %v1638_v5 = vpack.c.bf16 %v1600_v52, %v1599_v59  ;;  %v1595_v10 = vadd.f32 %v2979_v39, %v1576_v60  ;;  %v2992_v59 = vld [vmem:[#allocation14] ss:$0 sm:$0xff] }
 0x55f   :  { %v3270_v2 = vpop.f32.mrf.mxu1  ;;  %v1608_v19 = vrot.slane %v1600_v52, 6 }
 0x560   :  { %v1637_v3 = vpack.c.bf16 %v1598_v58, %v1597_v56  ;;  %v1593_v6 = vadd.f32 %v2979_v39, %v1568_v62  ;;  %v1579_v7 = vadd.f32 %v3270_v2, %v3258_v49  ;;  %v1606_v12 = vrot.slane %v1598_v58, 6 }
 0x561   :  { %v1570_v8 = vpop.f32.mrf.mxu1  ;;  %v1603_v20 = vmax.f32 %v1595_v10, 0.0  ;;  %v1617_v37 = vsel %vm1371_vm10, %v1607_v23, %v1608_v19 }
 0x562   :  { %v1571_v9 = vadd.f32 %v1570_v8, %v1481_v4  ;;  %3275 = vmatprep.mubr.msk.bf16.mxu0 %vm419_vm1, %v1637_v3  ;;  %v1601_v11 = vmax.f32 %v1593_v6, 0.0  ;;  %v1596_v13 = vadd.f32 %v2979_v39, %v1579_v7  ;;  %v1618_v33 = vsel %vm1371_vm10, %v1606_v12, %v1607_v23 }
 0x563   :  { %3276 = vmatmul.mubr.msk.bf16.vlgmr.msra.gmra.mxu0 %vm419_vm1, %v1638_v5  ;;  %v1619_v26 = vsel %vm1371_vm10, %v1605_v18, %v1606_v12  ;;  %v1630_v48 = vpack.c.bf16 %v1617_v37, %v1618_v33  ;;  %v1611_v40 = vrot.slane %v1603_v20, 6 }
 0x564   :  { %v1594_v14 = vadd.f32 %v2979_v39, %v1571_v9  ;;  %v1609_v15 = vrot.slane %v1601_v11, 6  ;;  %v1604_v16 = vmax.f32 %v1596_v13, 0.0 }
 0x566   :  { %v1602_v17 = vmax.f32 %v1594_v14, 0.0  ;;  %v1612_v22 = vrot.slane %v1604_v16, 6  ;;  %v1616_v28 = vsel %vm1371_vm10, %v1608_v19, %v1609_v15  ;;  %v1640_v36 = vpack.c.bf16 %v1604_v16, %v1603_v20 }
 0x567   :  { %v1625_v39 = vmul.f32 %v4354_v0, %v1616_v28  ;;  %v3471_v0 = vld [vmem:[%s4647_s24 + $0x8] sm:$0xff]  }
 0x568   :  { %v1610_v24 = vrot.slane %v1602_v17, 6  ;;  %v1639_v27 = vpack.c.bf16 %v1602_v17, %v1601_v11  ;;  %v1620_v30 = vsel %vm1371_vm10, %v1612_v22, %v1605_v18  ;;  %v1613_v42 = vsel %vm1371_vm10, %v1611_v40, %v1612_v22  ;;  %3295 = vmatprep.subr.bf16.mxu0 %v3471_v0 }
 0x569   :  { %v1621_v34 = vmul.f32 %v4342_v57, %v1620_v30  ;;  %3296 = vmatpush3.bf16.msra.mxu0 %v3471_v0 }
 0x56a   :  { %3279 = vmatprep.mubr.msk.bf16.mxu0 %vm419_vm1, %v1639_v27  ;;  %v1615_v35 = vsel %vm1371_vm10, %v1609_v15, %v1610_v24  ;;  %v1614_v41 = vsel %vm1371_vm10, %v1610_v24, %v1611_v40  ;;  %3297 = vmatprep.subr.bf16.mxu0 %v3473_v44 }
 0x56b   :  { %3280 = vmatmul.mubr.msk.bf16.gmra.mxu0 %vm419_vm1, %v1640_v36  ;;  %v1629_v38 = vpack.c.bf16 %v1619_v26, %v1621_v34  ;;  %v1631_v57 = vpack.c.bf16 %v1615_v35, %v1625_v39  ;;  %v1632_v43 = vpack.c.bf16 %v1613_v42, %v1614_v41 }
 0x56d   :  { %3287 = vmatprep.mubr.msk.bf16.mxu1 %vm419_vm1, %v1629_v38  ;;  %3298 = vmatpush3.bf16.msra.mxu0 %v3473_v44 }
 0x56e   :  { %3288 = vmatmul.mubr.msk.bf16.vlgmr.msra.gmra.mxu1 %vm419_vm1, %v1630_v48 }
 0x56f   :  { %3291 = vmatprep.mubr.msk.bf16.mxu1 %vm419_vm1, %v1631_v57  ;;  %3308 = vmatpush3.bf16.msra.mxu1 %v3472_v54 }
 0x570   :  { %3309 = vmatprep.subr.bf16.mxu1 %v3474_v45 }
 0x573   :  { %3310 = vmatpush3.bf16.msra.mxu1 %v3474_v45 }
 0x576   :  { %3292 = vmatmul.mubr.msk.bf16.gmra.mxu1 %vm419_vm1, %v1632_v43 }
 0x623   :  { %v3277_v47 = vpop.f32.mrf.mxu0 }
 0x625   :  { %v1703_v49 = vpop.f32.mrf.mxu0 }
 0x627   :  { %v3278_v52 = vpop.f32.mrf.mxu0 }
 0x629   :  { %v1706_v53 = vpop.f32.mrf.mxu0 }
 0x62b   :  { %v3281_v62 = vpop.f32.mrf.mxu0 }
 0x62d   :  { %v1719_v8 = vpop.f32.mrf.mxu0 }
 0x62e   :  { %v3289_v56 = vpop.f32.mrf.mxu1 }
 0x62f   :  { %v1801_v58 = vadd.f32 %v3289_v56, %v3277_v47  ;;  %v3282_v18 = vpop.f32.mrf.mxu0 }
 0x630   :  { %v1792_v60 = vpop.f32.mrf.mxu1 }
 0x631   :  { %v1793_v2 = vadd.f32 %v1792_v60, %v1703_v49  ;;  %v1832_v3 = vadd.f32 %v2992_v59, %v1801_v58  ;;  %v1722_v37 = vpop.f32.mrf.mxu0 }
 0x632   :  { %v3290_v4 = vpop.f32.mrf.mxu1 }
 0x633   :  { %v1830_v5 = vadd.f32 %v2992_v59, %v1793_v2  ;;  %v1804_v6 = vadd.f32 %v3290_v4, %v3278_v52  ;;  %v1840_v13 = vmax.f32 %v1832_v3, 0.0 }
 0x634   :  { %v1795_v7 = vpop.f32.mrf.mxu1 }
 0x635   :  { %v1838_v9 = vmax.f32 %v1830_v5, 0.0  ;;  %v1833_v10 = vadd.f32 %v2992_v59, %v1804_v6  ;;  %v1796_v11 = vadd.f32 %v1795_v7, %v1706_v53  ;;  %v1848_v23 = vadd.f32 %v1840_v13, %v4325_v31 }
 0x636   :  { %v3293_v14 = vpop.f32.mrf.mxu1 }
 0x637   :  { %v1841_v15 = vmax.f32 %v1833_v10, 0.0  ;;  %v1831_v16 = vadd.f32 %v2992_v59, %v1796_v11  ;;  %v1817_v12 = vadd.f32 %v3293_v14, %v3281_v62  ;;  %v1846_v19 = vadd.f32 %v1838_v9, %v4319_v25 }
 0x638   :  { %v1808_v17 = vpop.f32.mrf.mxu1 }
 0x639   :  { %v1849_v20 = vadd.f32 %v1841_v15, %v4321_v32  ;;  %v1839_v22 = vmax.f32 %v1831_v16, 0.0  ;;  %v1809_v24 = vadd.f32 %v1808_v17, %v1719_v8  ;;  %v1836_v30 = vadd.f32 %v2992_v59, %v1817_v12  ;;  %v3475_v16 = vld [vmem:[#allocation19 + $0x8] sm:$0xff]   ;;  %v3477_v12 = vld [vmem:[#allocation19] sm:$0xff]   ;;  %v3476_v17 = vld [vmem:[#allocation17 + $0x8] sm:$0xff]  }
 0x63a   :  { %v3294_v27 = vpop.f32.mrf.mxu1  ;;  %v4426_v35 = vmax.f32 %v1846_v19, 0.0  ;;  %v4430_v32 = vmax.f32 %v1848_v23, 0.0  ;;  %3319 = vmatprep.subr.bf16.mxu0 %v3475_v16  ;;  %3331 = vmatprep.subr.bf16.mxu1 %v3476_v17 }
 0x63b   :  { %v1847_v28 = vadd.f32 %v1839_v22, %v4323_v55  ;;  %v1820_v36 = vadd.f32 %v3294_v27, %v3282_v18  ;;  %v4424_v33 = vmax.f32 %v1849_v20, 0.0  ;;  %v1834_v34 = vadd.f32 %v2992_v59, %v1809_v24  ;;  %v3478_v18 = vld [vmem:[#allocation17] sm:$0xff]  }
 0x63c   :  { %v1811_v26 = vpop.f32.mrf.mxu1  ;;  %v1844_v48 = vmax.f32 %v1836_v30, 0.0 }
 0x63d   :  { %v4428_v38 = vmax.f32 %v1847_v28, 0.0  ;;  %v1837_v25 = vadd.f32 %v2992_v59, %v1820_v36  ;;  %v1842_v39 = vmax.f32 %v1834_v34, 0.0  ;;  %v1812_v31 = vadd.f32 %v1811_v26, %v1722_v37  ;;  %v3005_v26 = vld [vmem:[#allocation16] ss:$0 sm:$0xff] }
 0x63e   :  { %v1896_v40 = vpack.c.bf16 %v4424_v33, %v4430_v32  ;;  %v1852_v54 = vadd.f32 %v1844_v48, %v4351_v63  ;;  %v1865_v52 = vrot.slane %v4424_v33, 4  ;;  %v1864_v63 = vrot.slane %v4430_v32, 4 }
 0x63f   :  { %v1845_v57 = vmax.f32 %v1837_v25, 0.0  ;;  %v1895_v55 = vpack.c.bf16 %v4428_v38, %v4426_v35  ;;  %v1850_v41 = vadd.f32 %v1842_v39, %v4332_v51  ;;  %v1835_v42 = vadd.f32 %v2992_v59, %v1812_v31 }
 0x640   :  { %v1863_v47 = vrot.slane %v4428_v38, 4  ;;  %v4460_v58 = vmax.f32 %v1852_v54, 0.0  ;;  %v1875_v5 = vsel %vm1870_vm13, %v1864_v63, %v1865_v52 }
 0x641   :  { %v1853_v43 = vadd.f32 %v1845_v57, %v4335_v46  ;;  %3299 = vmatprep.mubr.msk.bf16.mxu0 %vm419_vm1, %v1895_v55  ;;  %v4439_v0 = vmax.f32 %v1850_v41, 0.0  ;;  %v1843_v44 = vmax.f32 %v1835_v42, 0.0  ;;  %v1862_v46 = vrot.slane %v4426_v35, 4 }
 0x642   :  { %3300 = vmatmul.mubr.msk.bf16.vlgmr.msra.gmra.mxu0 %vm419_vm1, %v1896_v40  ;;  %v1876_v60 = vsel %vm1870_vm13, %v1863_v47, %v1864_v63  ;;  %v1868_v11 = vrot.slane %v4460_v58, 4 }
 0x643   :  { %v4444_v45 = vmax.f32 %v1853_v43, 0.0  ;;  %v1866_v51 = vrot.slane %v4439_v0, 4  ;;  %v1851_v49 = vadd.f32 %v1843_v44, %v4347_v61  ;;  %v4465_v61 = vsel %vm766_vm12, 1.0, %v3966_v1  ;;  %3320 = vmatpush3.bf16.msra.mxu0 %v3475_v16 }
 0x644   :  { %v1877_v1 = vsel %vm1870_vm13, %v1862_v46, %v1863_v47  ;;  %v1888_v9 = vpack.c.bf16 %v1875_v5, %v1876_v60  ;;  %3321 = vmatprep.subr.bf16.mxu0 %v3477_v12 }
 0x645   :  { %v1869_v53 = vrot.slane %v4444_v45, 4  ;;  %v4458_v56 = vmax.f32 %v1851_v49, 0.0  ;;  %v1874_v59 = vsel %vm1870_vm13, %v1865_v52, %v1866_v51  ;;  %v1898_v4 = vpack.c.bf16 %v4444_v45, %v4460_v58 }
 0x646   :  { %v1883_v8 = vmul.f32 %v4465_v61, %v1874_v59 }
 0x647   :  { %v1878_v50 = vsel %vm1870_vm13, %v1869_v53, %v1862_v46  ;;  %v1867_v62 = vrot.slane %v4458_v56, 4  ;;  %v1897_v2 = vpack.c.bf16 %v4458_v56, %v4439_v0  ;;  %v1871_v14 = vsel %vm1870_vm13, %v1868_v11, %v1869_v53  ;;  %3322 = vmatpush3.bf16.msra.mxu0 %v3477_v12 }
 0x648   :  { %v1879_v3 = vmul.f32 %v4454_v29, %v1878_v50 }
 0x649   :  { %3303 = vmatprep.mubr.msk.bf16.mxu0 %vm419_vm1, %v1897_v2  ;;  %v1873_v7 = vsel %vm1870_vm13, %v1866_v51, %v1867_v62  ;;  %v1872_v13 = vsel %vm1870_vm13, %v1867_v62, %v1868_v11 }
 0x64a   :  { %v1887_v6 = vpack.c.bf16 %v1877_v1, %v1879_v3  ;;  %3304 = vmatmul.mubr.msk.bf16.gmra.mxu0 %vm419_vm1, %v1898_v4  ;;  %v1889_v10 = vpack.c.bf16 %v1873_v7, %v1883_v8  ;;  %v1890_v15 = vpack.c.bf16 %v1871_v14, %v1872_v13 }
 0x64c   :  { %3311 = vmatprep.mubr.msk.bf16.mxu1 %vm419_vm1, %v1887_v6 }
 0x64d   :  { %3312 = vmatmul.mubr.msk.bf16.vlgmr.msra.gmra.mxu1 %vm419_vm1, %v1888_v9 }
 0x64e   :  { %3315 = vmatprep.mubr.msk.bf16.mxu1 %vm419_vm1, %v1889_v10  ;;  %3332 = vmatpush3.bf16.msra.mxu1 %v3476_v17 }
 0x64f   :  { %3333 = vmatprep.subr.bf16.mxu1 %v3478_v18 }
 0x652   :  { %3334 = vmatpush3.bf16.msra.mxu1 %v3478_v18 }
 0x655   :  { %3316 = vmatmul.mubr.msk.bf16.gmra.mxu1 %vm419_vm1, %v1890_v15 }
 0x702   :  { %v3301_v19 = vpop.f32.mrf.mxu0 }
 0x704   :  { %v1961_v20 = vpop.f32.mrf.mxu0 }
 0x706   :  { %v3302_v22 = vpop.f32.mrf.mxu0 }
 0x708   :  { %v1964_v23 = vpop.f32.mrf.mxu0 }
 0x70a   :  { %v3305_v27 = vpop.f32.mrf.mxu0 }
 0x70c   :  { %v1977_v25 = vpop.f32.mrf.mxu0 }
 0x70d   :  { %v3313_v24 = vpop.f32.mrf.mxu1 }
 0x70e   :  { %v2059_v36 = vadd.f32 %v3313_v24, %v3301_v19  ;;  %v3306_v42 = vpop.f32.mrf.mxu0 }
 0x70f   :  { %v2050_v28 = vpop.f32.mrf.mxu1 }
 0x710   :  { %v2051_v30 = vadd.f32 %v2050_v28, %v1961_v20  ;;  %v2090_v55 = vadd.f32 %v3005_v26, %v2059_v36  ;;  %v1980_v63 = vpop.f32.mrf.mxu0 }
 0x711   :  { %v3314_v34 = vpop.f32.mrf.mxu1 }
 0x712   :  { %v2062_v37 = vadd.f32 %v3314_v34, %v3302_v22  ;;  %v2088_v31 = vadd.f32 %v3005_v26, %v2051_v30  ;;  %v2098_v51 = vmax.f32 %v2090_v55, 0.0 }
 0x713   :  { %v2053_v39 = vpop.f32.mrf.mxu1 }
 0x714   :  { %v2091_v48 = vadd.f32 %v3005_v26, %v2062_v37  ;;  %v2054_v57 = vadd.f32 %v2053_v39, %v1964_v23  ;;  %v2096_v54 = vmax.f32 %v2088_v31, 0.0  ;;  %v2106_v15 = vrot.slane %v2098_v51, 4  ;;  %v3481_v39 = vld [vmem:[#allocation22] sm:$0xff]   ;;  %v3480_v31 = vld [vmem:[%s4649_s27 + $0x8] sm:$0xff]  }
 0x715   :  { %v3317_v40 = vpop.f32.mrf.mxu1  ;;  %3355 = vmatprep.subr.bf16.mxu1 %v3480_v31 }
 0x716   :  { %v2089_v41 = vadd.f32 %v3005_v26, %v2054_v57  ;;  %v2099_v43 = vmax.f32 %v2091_v48, 0.0  ;;  %v2075_v49 = vadd.f32 %v3317_v40, %v3305_v27  ;;  %v2104_v10 = vrot.slane %v2096_v54, 4  ;;  %v3482_v48 = vld [vmem:[%s4649_s27] sm:$0xff]  }
 0x717   :  { %v2066_v44 = vpop.f32.mrf.mxu1 }
 0x718   :  { %v2097_v47 = vmax.f32 %v2089_v41, 0.0  ;;  %v2067_v46 = vadd.f32 %v2066_v44, %v1977_v25  ;;  %v2137_v50 = vpack.c.bf16 %v2099_v43, %v2098_v51  ;;  %v2094_v3 = vadd.f32 %v3005_v26, %v2075_v49 }
 0x719   :  { %v3318_v52 = vpop.f32.mrf.mxu1  ;;  %v2107_v11 = vrot.slane %v2099_v43, 4  ;;  %v3018_v43 = vld [vmem:[#allocation20] ss:$0 sm:$0xff] }
 0x71a   :  { %v2136_v53 = vpack.c.bf16 %v2097_v47, %v2096_v54  ;;  %v2092_v59 = vadd.f32 %v3005_v26, %v2067_v46  ;;  %v2078_v60 = vadd.f32 %v3318_v52, %v3306_v42  ;;  %v2105_v8 = vrot.slane %v2097_v47, 4 }
 0x71b   :  { %v2069_v62 = vpop.f32.mrf.mxu1  ;;  %v2102_v13 = vmax.f32 %v2094_v3, 0.0  ;;  %v2116_v27 = vsel %vm1870_vm13, %v2106_v15, %v2107_v11 }
 0x71c   :  { %v2070_v2 = vadd.f32 %v2069_v62, %v1980_v63  ;;  %3323 = vmatprep.mubr.msk.bf16.mxu0 %vm419_vm1, %v2136_v53  ;;  %v2100_v4 = vmax.f32 %v2092_v59, 0.0  ;;  %v2095_v1 = vadd.f32 %v3005_v26, %v2078_v60  ;;  %v2117_v20 = vsel %vm1870_vm13, %v2105_v8, %v2106_v15 }
 0x71d   :  { %3324 = vmatmul.mubr.msk.bf16.vlgmr.msra.gmra.mxu0 %vm419_vm1, %v2137_v50  ;;  %v2118_v23 = vsel %vm1870_vm13, %v2104_v10, %v2105_v8  ;;  %v2129_v36 = vpack.c.bf16 %v2116_v27, %v2117_v20 }
 0x71e   :  { %v2093_v5 = vadd.f32 %v3005_v26, %v2070_v2  ;;  %v2108_v6 = vrot.slane %v2100_v4, 4  ;;  %v2103_v7 = vmax.f32 %v2095_v1, 0.0 }
 0x720   :  { %v2101_v9 = vmax.f32 %v2093_v5, 0.0  ;;  %v2111_v14 = vrot.slane %v2103_v7, 4  ;;  %v2115_v17 = vsel %vm1870_vm13, %v2107_v11, %v2108_v6  ;;  %v2139_v19 = vpack.c.bf16 %v2103_v7, %v2102_v13 }
 0x721   :  { %v2124_v30 = vmul.f32 %v4465_v61, %v2115_v17  ;;  %v3479_v61 = vld [vmem:[#allocation22 + $0x8] sm:$0xff]  }
 0x722   :  { %v2109_v16 = vrot.slane %v2101_v9, 4  ;;  %v2138_v12 = vpack.c.bf16 %v2101_v9, %v2100_v4  ;;  %v2119_v18 = vsel %vm1870_vm13, %v2111_v14, %v2104_v10  ;;  %3343 = vmatprep.subr.bf16.mxu0 %v3479_v61 }
 0x723   :  { %v2120_v22 = vmul.f32 %v4454_v29, %v2119_v18  ;;  %v2110_v29 = vrot.slane %v2102_v13, 4  ;;  %3344 = vmatpush3.bf16.msra.mxu0 %v3479_v61 }
 0x724   :  { %3327 = vmatprep.mubr.msk.bf16.mxu0 %vm419_vm1, %v2138_v12  ;;  %v2114_v24 = vsel %vm1870_vm13, %v2108_v6, %v2109_v16  ;;  %3345 = vmatprep.subr.bf16.mxu0 %v3481_v39 }
 0x725   :  { %3328 = vmatmul.mubr.msk.bf16.gmra.mxu0 %vm419_vm1, %v2139_v19  ;;  %v2128_v28 = vpack.c.bf16 %v2118_v23, %v2120_v22  ;;  %v2130_v34 = vpack.c.bf16 %v2114_v24, %v2124_v30  ;;  %v2113_v26 = vsel %vm1870_vm13, %v2109_v16, %v2110_v29  ;;  %v2112_v37 = vsel %vm1870_vm13, %v2110_v29, %v2111_v14 }
 0x726   :  { %v2131_v25 = vpack.c.bf16 %v2112_v37, %v2113_v26 }
 0x727   :  { %3335 = vmatprep.mubr.msk.bf16.mxu1 %vm419_vm1, %v2128_v28  ;;  %3346 = vmatpush3.bf16.msra.mxu0 %v3481_v39 }
 0x728   :  { %3336 = vmatmul.mubr.msk.bf16.vlgmr.msra.gmra.mxu1 %vm419_vm1, %v2129_v36 }
 0x729   :  { %3339 = vmatprep.mubr.msk.bf16.mxu1 %vm419_vm1, %v2130_v34  ;;  %3356 = vmatpush3.bf16.msra.mxu1 %v3480_v31 }
 0x72a   :  { %3357 = vmatprep.subr.bf16.mxu1 %v3482_v48 }
 0x72d   :  { %3358 = vmatpush3.bf16.msra.mxu1 %v3482_v48 }
 0x730   :  { %3340 = vmatmul.mubr.msk.bf16.gmra.mxu1 %vm419_vm1, %v2131_v25 }
 0x7dd   :  { %v3325_v57 = vpop.f32.mrf.mxu0 }
 0x7df   :  { %v2202_v55 = vpop.f32.mrf.mxu0 }
 0x7e1   :  { %v3326_v40 = vpop.f32.mrf.mxu0 }
 0x7e3   :  { %v2205_v21 = vpop.f32.mrf.mxu0 }
 0x7e5   :  { %v3329_v54 = vpop.f32.mrf.mxu0 }
 0x7e7   :  { %v2218_v63 = vpop.f32.mrf.mxu0 }
 0x7e8   :  { %v3337_v41 = vpop.f32.mrf.mxu1 }
 0x7e9   :  { %v2300_v42 = vadd.f32 %v3337_v41, %v3325_v57  ;;  %v3330_v6 = vpop.f32.mrf.mxu0  ;;  %v3485_v41 = vld [vmem:[#allocation26] sm:$0xff]  }
 0x7ea   :  { %v2291_v44 = vpop.f32.mrf.mxu1 }
 0x7eb   :  { %v2292_v47 = vadd.f32 %v2291_v44, %v2202_v55  ;;  %v2331_v51 = vadd.f32 %v3018_v43, %v2300_v42  ;;  %v2221_v20 = vpop.f32.mrf.mxu0  ;;  %v3484_v42 = vld [vmem:[#allocation25 + $0x8] sm:$0xff]  }
 0x7ec   :  { %v3338_v49 = vpop.f32.mrf.mxu1  ;;  %3379 = vmatprep.subr.bf16.mxu1 %v3484_v42 }
 0x7ed   :  { %v2329_v46 = vadd.f32 %v3018_v43, %v2292_v47  ;;  %v2303_v52 = vadd.f32 %v3338_v49, %v3326_v40  ;;  %v2339_v62 = vmax.f32 %v2331_v51, 0.0 }
 0x7ee   :  { %v2294_v53 = vpop.f32.mrf.mxu1 }
 0x7ef   :  { %v2337_v50 = vmax.f32 %v2329_v46, 0.0  ;;  %v2332_v59 = vadd.f32 %v3018_v43, %v2303_v52  ;;  %v2295_v60 = vadd.f32 %v2294_v53, %v2205_v21  ;;  %v2347_v11 = vadd.f32 %v2339_v62, %v4430_v32  ;;  %v3483_v21 = vld [vmem:[#allocation26 + $0x8] sm:$0xff]  }
 0x7f0   :  { %v3341_v2 = vpop.f32.mrf.mxu1  ;;  %3367 = vmatprep.subr.bf16.mxu0 %v3483_v21 }
 0x7f1   :  { %v2340_v3 = vmax.f32 %v2332_v59, 0.0  ;;  %v2330_v4 = vadd.f32 %v3018_v43, %v2295_v60  ;;  %v2316_v1 = vadd.f32 %v3341_v2, %v3329_v54  ;;  %v2345_v7 = vadd.f32 %v2337_v50, %v4426_v35  ;;  %v3031_v59 = vld [vmem:[#allocation23] ss:$0 sm:$0xff] }
 0x7f2   :  { %v2307_v5 = vpop.f32.mrf.mxu1  ;;  %v4533_v23 = vmax.f32 %v2347_v11, 0.0 }
 0x7f3   :  { %v2348_v8 = vadd.f32 %v2340_v3, %v4424_v33  ;;  %v2338_v9 = vmax.f32 %v2330_v4, 0.0  ;;  %v2308_v10 = vadd.f32 %v2307_v5, %v2218_v63  ;;  %v2335_v15 = vadd.f32 %v3018_v43, %v2316_v1 }
 0x7f4   :  { %v3342_v13 = vpop.f32.mrf.mxu1  ;;  %v4529_v19 = vmax.f32 %v2345_v7, 0.0 }
 0x7f5   :  { %v2346_v14 = vadd.f32 %v2338_v9, %v4428_v38  ;;  %v2333_v16 = vadd.f32 %v3018_v43, %v2308_v10  ;;  %v2319_v12 = vadd.f32 %v3342_v13, %v3330_v6  ;;  %v4527_v17 = vmax.f32 %v2348_v8, 0.0 }
 0x7f6   :  { %v2310_v18 = vpop.f32.mrf.mxu1  ;;  %v2343_v32 = vmax.f32 %v2335_v15, 0.0 }
 0x7f7   :  { %v4531_v22 = vmax.f32 %v2346_v14, 0.0  ;;  %v2341_v35 = vmax.f32 %v2333_v16, 0.0  ;;  %v2336_v33 = vadd.f32 %v3018_v43, %v2319_v12  ;;  %v2311_v24 = vadd.f32 %v2310_v18, %v2221_v20 }
 0x7f8   :  { %v2378_v28 = vpack.c.bf16 %v4527_v17, %v4533_v23  ;;  %v2351_v26 = vadd.f32 %v2343_v32, %v4460_v58  ;;  %v2365_v48 = vmul.f32 0.0, %v4527_v17 }
 0x7f9   :  { %v2344_v27 = vmax.f32 %v2336_v33, 0.0  ;;  %v2377_v38 = vpack.c.bf16 %v4531_v22, %v4529_v19  ;;  %v2334_v30 = vadd.f32 %v3018_v43, %v2311_v24  ;;  %v2349_v36 = vadd.f32 %v2341_v35, %v4439_v0  ;;  %v3486_v43 = vld [vmem:[#allocation25] sm:$0xff]  }
 0x7fa   :  { %v4552_v0 = vmax.f32 %v2351_v26, 0.0  ;;  %v2370_v57 = vpack.c.bf16 %v4533_v23, %v4531_v22 }
 0x7fb   :  { %v2352_v34 = vadd.f32 %v2344_v27, %v4444_v45  ;;  %3347 = vmatprep.mubr.msk.bf16.mxu0 %vm419_vm1, %v2377_v38  ;;  %v2342_v29 = vmax.f32 %v2334_v30, 0.0  ;;  %v4547_v61 = vmax.f32 %v2349_v36, 0.0 }
 0x7fc   :  { %3348 = vmatmul.mubr.msk.bf16.vlgmr.msra.gmra.mxu0 %vm419_vm1, %v2378_v28 }
 0x7fd   :  { %v4544_v37 = vmax.f32 %v2352_v34, 0.0  ;;  %v2350_v25 = vadd.f32 %v2342_v29, %v4458_v56  ;;  %v2371_v55 = vpack.c.bf16 %v4547_v61, %v2365_v48  ;;  %3368 = vmatpush3.bf16.msra.mxu0 %v3483_v21 }
 0x7fe   :  { %3369 = vmatprep.subr.bf16.mxu0 %v3485_v41 }
 0x7ff   :  { %v2361_v39 = vmul.f32 0.0, %v4544_v37  ;;  %v4550_v31 = vmax.f32 %v2350_v25, 0.0  ;;  %v2380_v56 = vpack.c.bf16 %v4544_v37, %v4552_v0 }
 0x801   :  { %v2369_v45 = vpack.c.bf16 %v4529_v19, %v2361_v39  ;;  %v2379_v58 = vpack.c.bf16 %v4550_v31, %v4547_v61  ;;  %v2372_v40 = vpack.c.bf16 %v4552_v0, %v4550_v31  ;;  %3370 = vmatpush3.bf16.msra.mxu0 %v3485_v41 }
 0x803   :  { %3359 = vmatprep.mubr.msk.bf16.mxu1 %vm419_vm1, %v2369_v45  ;;  %3351 = vmatprep.mubr.msk.bf16.mxu0 %vm419_vm1, %v2379_v58 }
 0x804   :  { %3360 = vmatmul.mubr.msk.bf16.vlgmr.msra.gmra.mxu1 %vm419_vm1, %v2370_v57  ;;  %3352 = vmatmul.mubr.msk.bf16.gmra.mxu0 %vm419_vm1, %v2380_v56 }
 0x805   :  { %3363 = vmatprep.mubr.msk.bf16.mxu1 %vm419_vm1, %v2371_v55  ;;  %3380 = vmatpush3.bf16.msra.mxu1 %v3484_v42 }
 0x806   :  { %3381 = vmatprep.subr.bf16.mxu1 %v3486_v43 }
 0x809   :  { %3382 = vmatpush3.bf16.msra.mxu1 %v3486_v43 }
 0x80c   :  { %3364 = vmatmul.mubr.msk.bf16.gmra.mxu1 %vm419_vm1, %v2372_v40 }
 0x8bc   :  { %v3349_v44 = vpop.f32.mrf.mxu0 }
 0x8be   :  { %v2443_v54 = vpop.f32.mrf.mxu0 }
 0x8c0   :  { %v3350_v47 = vpop.f32.mrf.mxu0 }
 0x8c2   :  { %v2446_v51 = vpop.f32.mrf.mxu0 }
 0x8c4   :  { %v3361_v49 = vpop.f32.mrf.mxu1  ;;  %v3353_v46 = vpop.f32.mrf.mxu0 }
 0x8c5   :  { %v2541_v63 = vadd.f32 %v3361_v49, %v3349_v44  ;;  %v3044_v44 = vld [vmem:[%s4650_s19] ss:$0 sm:$0xff] }
 0x8c6   :  { %v2532_v52 = vpop.f32.mrf.mxu1  ;;  %v2459_v62 = vpop.f32.mrf.mxu0 }
 0x8c7   :  { %v2533_v53 = vadd.f32 %v2532_v52, %v2443_v54  ;;  %v2572_v5 = vadd.f32 %v3031_v59, %v2541_v63 }
 0x8c8   :  { %v3362_v50 = vpop.f32.mrf.mxu1  ;;  %v3354_v8 = vpop.f32.mrf.mxu0 }
 0x8c9   :  { %v2544_v60 = vadd.f32 %v3362_v50, %v3350_v47  ;;  %v2570_v3 = vadd.f32 %v3031_v59, %v2533_v53  ;;  %v2580_v14 = vmax.f32 %v2572_v5, 0.0 }
 0x8ca   :  { %v2535_v2 = vpop.f32.mrf.mxu1  ;;  %v2462_v33 = vpop.f32.mrf.mxu0 }
 0x8cb   :  { %v2573_v4 = vadd.f32 %v3031_v59, %v2544_v60  ;;  %v2536_v1 = vadd.f32 %v2535_v2, %v2446_v51  ;;  %v2578_v11 = vmax.f32 %v2570_v3, 0.0 }
 0x8cc   :  { %v3365_v6 = vpop.f32.mrf.mxu1 }
 0x8cd   :  { %v2571_v7 = vadd.f32 %v3031_v59, %v2536_v1  ;;  %v2581_v9 = vmax.f32 %v2573_v4, 0.0  ;;  %v2557_v15 = vadd.f32 %v3365_v6, %v3353_v46 }
 0x8ce   :  { %v2548_v10 = vpop.f32.mrf.mxu1 }
 0x8cf   :  { %v2579_v13 = vmax.f32 %v2571_v7, 0.0  ;;  %v2549_v16 = vadd.f32 %v2548_v10, %v2459_v62  ;;  %v2603_v35 = vpack.c.bf16 %v2581_v9, %v2580_v14  ;;  %v2576_v28 = vadd.f32 %v3031_v59, %v2557_v15 }
 0x8d0   :  { %v3366_v12 = vpop.f32.mrf.mxu1  ;;  %v2590_v39 = vmul.f32 0.0, %v2581_v9 }
 0x8d1   :  { %v2602_v18 = vpack.c.bf16 %v2579_v13, %v2578_v11  ;;  %v2560_v20 = vadd.f32 %v3366_v12, %v3354_v8  ;;  %v2574_v32 = vadd.f32 %v3031_v59, %v2549_v16  ;;  %v2584_v25 = vmax.f32 %v2576_v28, 0.0 }
 0x8d2   :  { %v2551_v24 = vpop.f32.mrf.mxu1  ;;  %v2595_v57 = vpack.c.bf16 %v2580_v14, %v2579_v13 }
 0x8d3   :  { %v2577_v27 = vadd.f32 %v3031_v59, %v2560_v20  ;;  %v2552_v38 = vadd.f32 %v2551_v24, %v2462_v33  ;;  %3371 = vmatprep.mubr.msk.bf16.mxu0 %vm419_vm1, %v2602_v18  ;;  %v2582_v34 = vmax.f32 %v2574_v32, 0.0 }
 0x8d4   :  { %3372 = vmatmul.mubr.msk.bf16.vlgmr.msra.gmra.mxu0 %vm419_vm1, %v2603_v35 }
 0x8d5   :  { %v2585_v30 = vmax.f32 %v2577_v27, 0.0  ;;  %v2575_v36 = vadd.f32 %v3031_v59, %v2552_v38  ;;  %v2596_v56 = vpack.c.bf16 %v2582_v34, %v2590_v39 }
 0x8d7   :  { %v2586_v29 = vmul.f32 0.0, %v2585_v30  ;;  %v2583_v26 = vmax.f32 %v2575_v36, 0.0  ;;  %v2605_v58 = vpack.c.bf16 %v2585_v30, %v2584_v25 }
 0x8d9   :  { %v2594_v45 = vpack.c.bf16 %v2578_v11, %v2586_v29  ;;  %v2604_v48 = vpack.c.bf16 %v2583_v26, %v2582_v34  ;;  %v2597_v55 = vpack.c.bf16 %v2584_v25, %v2583_v26 }
 0x8db   :  { %3375 = vmatprep.mubr.msk.bf16.mxu0 %vm419_vm1, %v2604_v48  ;;  %3383 = vmatprep.mubr.msk.bf16.mxu1 %vm419_vm1, %v2594_v45 }
 0x8dc   :  { %3376 = vmatmul.mubr.msk.bf16.gmra.mxu0 %vm419_vm1, %v2605_v58  ;;  %3384 = vmatmul.mubr.msk.bf16.vlgmr.msra.gmra.mxu1 %vm419_vm1, %v2595_v57 }
 0x8dd   :  { %3387 = vmatprep.mubr.msk.bf16.mxu1 %vm419_vm1, %v2596_v56 }
 0x8e4   :  { %3388 = vmatmul.mubr.msk.bf16.gmra.mxu1 %vm419_vm1, %v2597_v55 }
 0x994   :  { %v3373_v40 = vpop.f32.mrf.mxu0 }
 0x996   :  { %v2668_v21 = vpop.f32.mrf.mxu0 }
 0x998   :  { %v3374_v41 = vpop.f32.mrf.mxu0 }
 0x99a   :  { %v2671_v42 = vpop.f32.mrf.mxu0 }
 0x99c   :  { %v3385_v43 = vpop.f32.mrf.mxu1  ;;  %v3377_v47 = vpop.f32.mrf.mxu0 }
 0x99d   :  { %v2766_v54 = vadd.f32 %v3385_v43, %v3373_v40 }
 0x99e   :  { %v2757_v51 = vpop.f32.mrf.mxu1  ;;  %v2684_v59 = vpop.f32.mrf.mxu0 }
 0x99f   :  { %v2797_v49 = vadd.f32 %v3044_v44, %v2766_v54  ;;  %v2758_v46 = vadd.f32 %v2757_v51, %v2668_v21 }
 0x9a0   :  { %v3386_v52 = vpop.f32.mrf.mxu1  ;;  %v3378_v9 = vpop.f32.mrf.mxu0 }
 0x9a1   :  { %v2805_v53 = vmax.f32 %v2797_v49, 0.0  ;;  %v2795_v63 = vadd.f32 %v3044_v44, %v2758_v46  ;;  %v2769_v50 = vadd.f32 %v3386_v52, %v3374_v41 }
 0x9a2   :  { %v2760_v60 = vpop.f32.mrf.mxu1  ;;  %v2687_v24 = vpop.f32.mrf.mxu0 }
 0x9a3   :  { %v2813_v62 = vadd.f32 %v2805_v53, %v4533_v23  ;;  %v2803_v2 = vmax.f32 %v2795_v63, 0.0  ;;  %v2798_v3 = vadd.f32 %v3044_v44, %v2769_v50  ;;  %v2761_v4 = vadd.f32 %v2760_v60, %v2671_v42 }
 0x9a4   :  { %v3389_v1 = vpop.f32.mrf.mxu1 }
 0x9a5   :  { %v2821_v5 = vmax.f32 %v2813_v62, 0.0  ;;  %v2811_v6 = vadd.f32 %v2803_v2, %v4529_v19  ;;  %v2806_v7 = vmax.f32 %v2798_v3, 0.0  ;;  %v2796_v8 = vadd.f32 %v3044_v44, %v2761_v4 }
 0x9a6   :  { %v2782_v10 = vadd.f32 %v3389_v1, %v3377_v47  ;;  %v2773_v11 = vpop.f32.mrf.mxu1 }
 0x9a7   :  { %v3055_v13 = vpack.c.bf16 %v2821_v5, %v2821_v5  ;;  %v2819_v14 = vmax.f32 %v2811_v6, 0.0  ;;  %v2814_v15 = vadd.f32 %v2806_v7, %v4527_v17  ;;  %v2804_v23 = vmax.f32 %v2796_v8, 0.0 }
 0x9a8   :  { %v2801_v16 = vadd.f32 %v3044_v44, %v2782_v10  ;;  %v2774_v12 = vadd.f32 %v2773_v11, %v2684_v59  ;;  %v3390_v18 = vpop.f32.mrf.mxu1 }
 0x9a9   :  { %2862 = vst.msk [vmem:[%s4149_s5 + $0x8] sm:$0xf] %vm2859_vm14, %v3055_v13  ;;  %v3053_v20 = vpack.c.bf16 %v2819_v14, %v2819_v14  ;;  %v2822_v19 = vmax.f32 %v2814_v15, 0.0  ;;  %v2812_v35 = vadd.f32 %v2804_v23, %v4531_v22  ;;  %v2785_v33 = vadd.f32 %v3390_v18, %v3378_v9 }
 0x9aa   :  { %v2809_v32 = vmax.f32 %v2801_v16, 0.0  ;;  %v2799_v27 = vadd.f32 %v3044_v44, %v2774_v12  ;;  %v2776_v38 = vpop.f32.mrf.mxu1 }
 0x9ab   :  { %2860 = vst.msk [vmem:[%s4149_s5] sm:$0xf] %vm2859_vm14, %v3053_v20  ;;  %v3056_v17 = vpack.c.bf16 %v2822_v19, %v2822_v19  ;;  %v2820_v28 = vmax.f32 %v2812_v35, 0.0  ;;  %v2802_v30 = vadd.f32 %v3044_v44, %v2785_v33  ;;  %v2777_v36 = vadd.f32 %v2776_v38, %v2687_v24 }
 0x9ac   :  { %v2817_v34 = vadd.f32 %v2809_v32, %v4552_v0  ;;  %v2807_v29 = vmax.f32 %v2799_v27, 0.0 }
 0x9ad   :  { %2863 = vst.msk [vmem:[%s4149_s5 + $0xc] sm:$0xf] %vm2859_vm14, %v3056_v17  ;;  %v3054_v26 = vpack.c.bf16 %v2820_v28, %v2820_v28  ;;  %v2810_v22 = vmax.f32 %v2802_v30, 0.0  ;;  %v2800_v25 = vadd.f32 %v3044_v44, %v2777_v36 }
 0x9ae   :  { %v2825_v39 = vmax.f32 %v2817_v34, 0.0  ;;  %v2815_v45 = vadd.f32 %v2807_v29, %v4547_v61 }
 0x9af   :  { %2861 = vst.msk [vmem:[%s4149_s5 + $0x4] sm:$0xf] %vm2859_vm14, %v3054_v26  ;;  %v2818_v48 = vadd.f32 %v2810_v22, %v4544_v37  ;;  %v2808_v57 = vmax.f32 %v2800_v25, 0.0 }
 0x9b0   :  { %v3059_v58 = vpack.c.bf16 %v2825_v39, %v2825_v39  ;;  %v2823_v56 = vmax.f32 %v2815_v45, 0.0 }
 0x9b1   :  { %v2826_v0 = vmax.f32 %v2818_v48, 0.0  ;;  %v2816_v55 = vadd.f32 %v2808_v57, %v4550_v31 }
 0x9b2   :  { %2866 = vst.msk [vmem:[%s4149_s5 + $0x18] sm:$0xf] %vm2859_vm14, %v3059_v58  ;;  %v3057_v40 = vpack.c.bf16 %v2823_v56, %v2823_v56 }
 0x9b3   :  { %v3060_v21 = vpack.c.bf16 %v2826_v0, %v2826_v0  ;;  %v2824_v41 = vmax.f32 %v2816_v55, 0.0 }
 0x9b4   :  { %2864 = vst.msk [vmem:[%s4149_s5 + $0x10] sm:$0xf] %vm2859_vm14, %v3057_v40 }
 0x9b5   :  { %2867 = vst.msk [vmem:[%s4149_s5 + $0x1c] sm:$0xf] %vm2859_vm14, %v3060_v21  ;;  %v3058_v61 = vpack.c.bf16 %v2824_v41, %v2824_v41 }
 0x9b7   :  { %2865 = vst.msk [vmem:[%s4149_s5 + $0x14] sm:$0xf] %vm2859_vm14, %v3058_v61 }
 0x9b8   :  { %2876 = vsyncpa [#allocation4], 1 }
 0x9b9   :  { %2877 = vsyncpa [#allocation6], 1 }
 0x9ba   :  { %2878 = vsyncpa [#allocation9], 1 }
 0x9bb   :  { %2879 = vsyncpa [#allocation12], 1 }
 0x9bc   :  { %2880 = vsyncpa [#allocation15], 1 }
 0x9bd   :  { %2881 = vsyncpa [#allocation18], 1 }
 0x9be   :  { %2882 = vsyncpa [#allocation21], 1 }
 0x9bf   :  { %2883 = vsyncpa [#allocation24], 1 }
 0x9c0   :  { %2884 = vsyncpa [#allocation27], 1 }
 0x9c1   :  { %2885 = vsyncpa [#allocation30], 1 }
 0x9c2   :  { %2886 = vsyncpa [#allocation33], 1 }

</bundles_post_ra>
